<compile_context>
chip_gen: v7x
topology: tpu7x:2x2x1
jax: 0.10.0
libtpu: 0.0.40
codegen_flags: <defaults>
</compile_context>

<pallas_src>
import functools

import jax
import jax.numpy as jnp
from jax.experimental import pallas as pl
from jax.experimental.pallas import tpu as pltpu

_LANE = 128


def _round_up(a, m):
    return ((a + m - 1) // m) * m


# ----------------------------------------------------------------------------
# Kernel
# ----------------------------------------------------------------------------
def _autoencoder_kernel(
    x_ref,                                   # (TB, 784) bf16 (cast in wrapper)
    w1_ref, b1_ref, w2_ref, b2_ref,          # encoder trunk 784 -> 512 -> 128
    wh_ref, bh_ref,                          # fused head [w3_padded | w3@w4], (128, enc_pad+128)
    w5_ref, b5_ref, w6_ref, b6_ref,          # decoder 128 -> 512 -> 784
    dec_ref, encp_ref,
):
    bf16 = jnp.bfloat16
    f32 = jnp.float32
    enc_pad = encp_ref.shape[-1]

    x = x_ref[...]                           # already bf16

    # ---- encoder trunk: 784 -> 512 -> 128 ----
    h = jnp.dot(x, w1_ref[...], preferred_element_type=f32) + b1_ref[...]
    h = jnp.maximum(h, 0.0).astype(bf16)
    h = jnp.dot(h, w2_ref[...], preferred_element_type=f32) + b2_ref[...]
    h2 = jnp.maximum(h, 0.0).astype(bf16)

    # ---- fused encoder head + decoder entry: one N = enc_pad + 128 matmul ----
    hh = jnp.dot(h2, wh_ref[...], preferred_element_type=f32) + bh_ref[...]
    encp_ref[...] = hh[:, :enc_pad].astype(encp_ref.dtype)      # lane-dense slab
    h = jnp.maximum(hh[:, enc_pad:], 0.0).astype(bf16)          # decoder entry (128)

    # ---- decoder tail: 128 -> 512 -> 784 ----
    h = jnp.dot(h, w5_ref[...], preferred_element_type=f32) + b5_ref[...]
    h = jnp.maximum(h, 0.0).astype(bf16)
    d = jnp.dot(h, w6_ref[...], preferred_element_type=f32) + b6_ref[...]
    dec_ref[...] = d.astype(dec_ref.dtype)


_PARAM_ORDER = ("w1", "b1", "w2", "b2", "wh", "bh", "w5", "b5", "w6", "b6")


# ----------------------------------------------------------------------------
# Host-side parameter preparation (bf16 cast, lane-padded + fused head)
# ----------------------------------------------------------------------------
def prepare_kernel_params(params, weight_dtype=jnp.bfloat16):
    f32 = jnp.float32
    latent_dim = params["w3"].shape[1]
    enc_pad = _round_up(latent_dim, _LANE)   # lane-dense encoded slab width

    w3 = params["w3"].astype(f32)
    w4 = params["w4"].astype(f32)
    b3 = params["b3"].astype(f32)
    b4 = params["b4"].astype(f32)

    # Encoder head padded to full 128-lane output (extra columns exact zeros).
    w3p = jnp.zeros((w3.shape[0], enc_pad), f32).at[:, :latent_dim].set(w3)
    b3p = jnp.zeros((1, enc_pad), f32).at[:, :latent_dim].set(b3)

    # Fold the degenerate latent-dim matmuls (no nonlinearity in between):
    #   relu((h2 @ w3 + b3) @ w4 + b4) == relu(h2 @ (w3 @ w4) + (b3 @ w4 + b4))
    # NOTE: keep this fusion for small latent dims (bf16 rounding gap grows with K).
    w34 = w3 @ w4
    b34 = b3 @ w4 + b4

    # Single head weight: columns [0:enc_pad) -> encoded, [enc_pad:) -> decoder
    # entry.  One 256-wide matmul fills the v6e/v7x MXU instead of two N=128s.
    wh = jnp.concatenate([w3p, w34], axis=1)
    bh = jnp.concatenate([b3p, b34], axis=1)

    kp = {
        "w1": params["w1"].astype(weight_dtype), "b1": params["b1"].astype(f32),
        "w2": params["w2"].astype(weight_dtype), "b2": params["b2"].astype(f32),
        "wh": wh.astype(weight_dtype),           "bh": bh,
        "w5": params["w5"].astype(weight_dtype), "b5": params["b5"].astype(f32),
        "w6": params["w6"].astype(weight_dtype), "b6": params["b6"].astype(f32),
    }
    return kp, latent_dim, enc_pad


# ----------------------------------------------------------------------------
# Specs / tiling helpers
# ----------------------------------------------------------------------------
def _resident_spec(a):
    # Full array, constant block index -> fetched once, VMEM-resident across
    # the whole grid.  Single-buffered (block never changes) to save VMEM.
    idx = lambda i: (0,) * a.ndim
    try:
        return pl.BlockSpec(a.shape, idx, pipeline_mode=pl.Buffered(1))
    except Exception:  # older JAX without pipeline_mode: default double-buffered
        return pl.BlockSpec(a.shape, idx)


def _choose_block_b(B, block_b):
    """Batch tile: large (amortizes ~0.35us/step pipeline overhead + MXU weight
    pushes) but never a single grid step, so both v7x TensorCores get work."""
    B8 = _round_up(max(B, 1), 8)
    return max(8, min(block_b, _round_up(-(-B8 // 2), 8)))


# ----------------------------------------------------------------------------
# Jitted forward
# ----------------------------------------------------------------------------
@functools.partial(jax.jit, static_argnames=("latent_dim", "block_b", "out_dtype"))
def _forward_jit(x, ordered, *, latent_dim, block_b, out_dtype):
    B = x.shape[0]
    if x.ndim > 2:
        x = x.reshape(B, -1)
    # bf16 input: halves the input DMA and the per-tile x VMEM buffer.
    x = x.astype(jnp.bfloat16)
    input_dim = x.shape[1]
    enc_pad = _round_up(latent_dim, _LANE)

    TB = _choose_block_b(B, block_b)
    num_tiles = pl.cdiv(B, TB)
    B_pad = num_tiles * TB
    if B_pad != B:
        x = jnp.pad(x, ((0, B_pad - B), (0, 0)))

    def batch_spec(ncols):
        return pl.BlockSpec((TB, ncols), lambda i: (i, 0))

    decoded, encoded_pad = pl.pallas_call(
        _autoencoder_kernel,
        grid=(num_tiles,),
        out_shape=(
            jax.ShapeDtypeStruct((B_pad, input_dim), out_dtype),
            jax.ShapeDtypeStruct((B_pad, enc_pad), out_dtype),
        ),
        in_specs=[batch_spec(input_dim)] + [_resident_spec(a) for a in ordered],
        out_specs=(batch_spec(input_dim), batch_spec(enc_pad)),
        compiler_params=pltpu.CompilerParams(
            dimension_semantics=("parallel",),
            vmem_limit_bytes=32 << 20,
        ),
    )(x, *ordered)

    return decoded[:B], encoded_pad[:B, :latent_dim]


def make_autoencoder_forward(params, *, block_b=512, out_dtype=jnp.float32,
                             weight_dtype=jnp.bfloat16):
    """Prepare (cast/pad/fuse) parameters ONCE and return a jitted forward:
    x -> (decoded, encoded), matching the PyTorch module's forward()."""
    kp, latent_dim, _ = prepare_kernel_params(params, weight_dtype)
    ordered = tuple(kp[k] for k in _PARAM_ORDER)

    def forward(x):
        return _forward_jit(x, ordered, latent_dim=latent_dim,
                            block_b=block_b, out_dtype=out_dtype)

    return forward


def custom_autoencoder_forward(x, params, *, block_b=512, out_dtype=jnp.float32):
    """One-shot convenience wrapper (prefer make_autoencoder_forward for reuse)."""
    return make_autoencoder_forward(params, block_b=block_b, out_dtype=out_dtype)(x)


# ----------------------------------------------------------------------------
# Init + references
# ----------------------------------------------------------------------------
def init_params(key, input_dim=784, latent_dim=2):
    """PyTorch-Linear-like init U(-1/sqrt(fan_in), 1/sqrt(fan_in)).
    Weights stored [in, out]; biases [1, out]."""
    dims = [
        (input_dim, 512), (512, 128), (128, latent_dim),   # encoder
        (latent_dim, 128), (128, 512), (512, input_dim),   # decoder
    ]
    params = {}
    for i, (fan_in, fan_out) in enumerate(dims, start=1):
        key, kw, kb = jax.random.split(key, 3)
        bound = 1.0 / jnp.sqrt(float(fan_in))
        params[f"w{i}"] = jax.random.uniform(
            kw, (fan_in, fan_out), jnp.float32, minval=-bound, maxval=bound)
        params[f"b{i}"] = jax.random.uniform(
            kb, (1, fan_out), jnp.float32, minval=-bound, maxval=bound)
    return params


def _matched_reference(x, kp, latent_dim):
    """Plain-JAX reference mirroring the kernel's math exactly
    (bf16 weights/activations, f32 accumulation, fused head)."""
    bf16, f32 = jnp.bfloat16, jnp.float32
    B = x.shape[0]
    if x.ndim > 2:
        x = x.reshape(B, -1)
    enc_pad = kp["bh"].shape[1] - 128
    h = x.astype(bf16)
    h = jnp.dot(h, kp["w1"], preferred_element_type=f32) + kp["b1"]
    h = jnp.maximum(h, 0.0).astype(bf16)
    h = jnp.dot(h, kp["w2"], preferred_element_type=f32) + kp["b2"]
    h2 = jnp.maximum(h, 0.0).astype(bf16)
    hh = jnp.dot(h2, kp["wh"], preferred_element_type=f32) + kp["bh"]
    enc = hh[:, :latent_dim]
    h = jnp.maximum(hh[:, enc_pad:], 0.0).astype(bf16)
    h = jnp.dot(h, kp["w5"], preferred_element_type=f32) + kp["b5"]
    h = jnp.maximum(h, 0.0).astype(bf16)
    d = jnp.dot(h, kp["w6"], preferred_element_type=f32) + kp["b6"]
    return d, enc


def _reference_forward_f32(x, params):
    """Full-f32 reference of the original module semantics."""
    B = x.shape[0]
    if x.ndim > 2:
        x = x.reshape(B, -1)
    h = jnp.maximum(x @ params["w1"] + params["b1"], 0.0)
    h = jnp.maximum(h @ params["w2"] + params["b2"], 0.0)
    z = h @ params["w3"] + params["b3"]
    h = jnp.maximum(z @ params["w4"] + params["b4"], 0.0)
    h = jnp.maximum(h @ params["w5"] + params["b5"], 0.0)
    d = h @ params["w6"] + params["b6"]
    return d, z


# ----------------------------------------------------------------------------
# Demo / self-test
# ----------------------------------------------------------------------------
if __name__ == "__main__":
    key = jax.random.PRNGKey(0)
    key, k_x = jax.random.split(key)

    input_dim, latent_dim = 784, 2
    batch = 50   # not a multiple of 8 -> exercises batch padding + 2 grid steps
    params = init_params(key, input_dim=input_dim, latent_dim=latent_dim)

    # MNIST-like input: (B, 1, 28, 28); forward flattens to (B, 784).
    x = jax.random.normal(k_x, (batch, 1, 28, 28), dtype=jnp.float32)

    forward = make_autoencoder_forward(params)   # param prep + jit hoisted out
    decoded, encoded = forward(x)
    decoded = jax.block_until_ready(decoded)
    encoded = jax.block_until_ready(encoded)

    assert decoded.shape == (batch, input_dim), decoded.shape
    assert encoded.shape == (batch, latent_dim), encoded.shape
    assert decoded.dtype == jnp.float32 and encoded.dtype == jnp.float32

    # Tight check against a reference performing the identical bf16/f32 math.
    kp, _, _ = prepare_kernel_params(params)
    ref_dec, ref_enc = _matched_reference(x, kp, latent_dim)
    assert jnp.allclose(decoded, ref_dec, atol=1e-2, rtol=1e-2)
    assert jnp.allclose(encoded, ref_enc, atol=1e-2, rtol=1e-2)

    # Loose check against full-f32 module semantics (bf16 weights/input + latent
    # fusion only introduce ~1% rounding differences).
    f32_dec, f32_enc = _reference_forward_f32(x, params)
    assert jnp.allclose(decoded, f32_dec, atol=1e-1, rtol=1e-1)
    assert jnp.allclose(encoded, f32_enc, atol=1e-1, rtol=1e-1)

    print("KERNEL_OK")
</pallas_src>

<mosaic_0001>
module attributes {stable_mosaic.version = 11 : i64} {
  func.func @_autoencoder_kernel(%arg0: i32, %arg1: memref<32x784xbf16, #tpu.memory_space<vmem>>, %arg2: memref<784x512xbf16, #tpu.memory_space<vmem>>, %arg3: memref<1x512xf32, #tpu.memory_space<vmem>>, %arg4: memref<512x128xbf16, #tpu.memory_space<vmem>>, %arg5: memref<1x128xf32, #tpu.memory_space<vmem>>, %arg6: memref<128x256xbf16, #tpu.memory_space<vmem>>, %arg7: memref<1x256xf32, #tpu.memory_space<vmem>>, %arg8: memref<128x512xbf16, #tpu.memory_space<vmem>>, %arg9: memref<1x512xf32, #tpu.memory_space<vmem>>, %arg10: memref<512x784xbf16, #tpu.memory_space<vmem>>, %arg11: memref<1x784xf32, #tpu.memory_space<vmem>>, %arg12: memref<32x784xf32, #tpu.memory_space<vmem>>, %arg13: memref<32x128xf32, #tpu.memory_space<vmem>>) attributes {dimension_semantics = [#tpu.dimension_semantics<parallel>], iteration_bounds = array<i64: 2>, scalar_prefetch = 0 : i64, scratch_operands = 0 : i64, tpu.core_type = #tpu.core_type<tc>, window_params = [{transform_indices = @transform_0, window_bounds = array<i64: 32, 784>}, {pipeline_mode = #tpu.pipeline_mode<synchronous>, transform_indices = @transform_1, window_bounds = array<i64: 784, 512>}, {pipeline_mode = #tpu.pipeline_mode<synchronous>, transform_indices = @transform_2, window_bounds = array<i64: 1, 512>}, {pipeline_mode = #tpu.pipeline_mode<synchronous>, transform_indices = @transform_3, window_bounds = array<i64: 512, 128>}, {pipeline_mode = #tpu.pipeline_mode<synchronous>, transform_indices = @transform_4, window_bounds = array<i64: 1, 128>}, {pipeline_mode = #tpu.pipeline_mode<synchronous>, transform_indices = @transform_5, window_bounds = array<i64: 128, 256>}, {pipeline_mode = #tpu.pipeline_mode<synchronous>, transform_indices = @transform_6, window_bounds = array<i64: 1, 256>}, {pipeline_mode = #tpu.pipeline_mode<synchronous>, transform_indices = @transform_7, window_bounds = array<i64: 128, 512>}, {pipeline_mode = #tpu.pipeline_mode<synchronous>, transform_indices = @transform_8, window_bounds = array<i64: 1, 512>}, {pipeline_mode = #tpu.pipeline_mode<synchronous>, transform_indices = @transform_9, window_bounds = array<i64: 512, 784>}, {pipeline_mode = #tpu.pipeline_mode<synchronous>, transform_indices = @transform_10, window_bounds = array<i64: 1, 784>}, {transform_indices = @transform_11, window_bounds = array<i64: 32, 784>}, {transform_indices = @transform_12, window_bounds = array<i64: 32, 128>}]} {
    %c0 = arith.constant 0 : index
    %c0_0 = arith.constant 0 : index
    %0 = vector.load %arg1[%c0, %c0_0] : memref<32x784xbf16, #tpu.memory_space<vmem>>, vector<32x784xbf16>
    %c0_1 = arith.constant 0 : index
    %c0_2 = arith.constant 0 : index
    %1 = vector.load %arg2[%c0_1, %c0_2] : memref<784x512xbf16, #tpu.memory_space<vmem>>, vector<784x512xbf16>
    %cst = arith.constant dense<0.000000e+00> : vector<32x512xf32>
    %2 = tpu.matmul %0, %1, %cst {dimension_numbers = #tpu.dot_dimension_numbers<[1], [0], [0], [1], [0, 0, 1, 1], [], []>} : vector<32x784xbf16>, vector<784x512xbf16>, vector<32x512xf32> -> vector<32x512xf32>
    %c0_3 = arith.constant 0 : index
    %c0_4 = arith.constant 0 : index
    %3 = vector.load %arg3[%c0_3, %c0_4] : memref<1x512xf32, #tpu.memory_space<vmem>>, vector<1x512xf32>
    %4 = vector.broadcast %3 : vector<1x512xf32> to vector<32x512xf32>
    %5 = arith.addf %2, %4 : vector<32x512xf32>
    %cst_5 = arith.constant 0.000000e+00 : f32
    %6 = vector.broadcast %cst_5 : f32 to vector<32x512xf32>
    %7 = arith.maximumf %5, %6 : vector<32x512xf32>
    %8 = arith.truncf %7 : vector<32x512xf32> to vector<32x512xbf16>
    %c0_6 = arith.constant 0 : index
    %c0_7 = arith.constant 0 : index
    %9 = vector.load %arg4[%c0_6, %c0_7] : memref<512x128xbf16, #tpu.memory_space<vmem>>, vector<512x128xbf16>
    %cst_8 = arith.constant dense<0.000000e+00> : vector<32x128xf32>
    %10 = tpu.matmul %8, %9, %cst_8 {dimension_numbers = #tpu.dot_dimension_numbers<[1], [0], [0], [1], [0, 0, 1, 1], [], []>} : vector<32x512xbf16>, vector<512x128xbf16>, vector<32x128xf32> -> vector<32x128xf32>
    %c0_9 = arith.constant 0 : index
    %c0_10 = arith.constant 0 : index
    %11 = vector.load %arg5[%c0_9, %c0_10] : memref<1x128xf32, #tpu.memory_space<vmem>>, vector<1x128xf32>
    %12 = vector.broadcast %11 : vector<1x128xf32> to vector<32x128xf32>
    %13 = arith.addf %10, %12 : vector<32x128xf32>
    %cst_11 = arith.constant 0.000000e+00 : f32
    %14 = vector.broadcast %cst_11 : f32 to vector<32x128xf32>
    %15 = arith.maximumf %13, %14 : vector<32x128xf32>
    %16 = arith.truncf %15 : vector<32x128xf32> to vector<32x128xbf16>
    %c0_12 = arith.constant 0 : index
    %c0_13 = arith.constant 0 : index
    %17 = vector.load %arg6[%c0_12, %c0_13] : memref<128x256xbf16, #tpu.memory_space<vmem>>, vector<128x256xbf16>
    %cst_14 = arith.constant dense<0.000000e+00> : vector<32x256xf32>
    %18 = tpu.matmul %16, %17, %cst_14 {dimension_numbers = #tpu.dot_dimension_numbers<[1], [0], [0], [1], [0, 0, 1, 1], [], []>} : vector<32x128xbf16>, vector<128x256xbf16>, vector<32x256xf32> -> vector<32x256xf32>
    %c0_15 = arith.constant 0 : index
    %c0_16 = arith.constant 0 : index
    %19 = vector.load %arg7[%c0_15, %c0_16] : memref<1x256xf32, #tpu.memory_space<vmem>>, vector<1x256xf32>
    %20 = vector.broadcast %19 : vector<1x256xf32> to vector<32x256xf32>
    %21 = arith.addf %18, %20 : vector<32x256xf32>
    %22 = vector.extract_strided_slice %21 {offsets = [0, 0], sizes = [32, 128], strides = [1, 1]} : vector<32x256xf32> to vector<32x128xf32>
    %c0_17 = arith.constant 0 : index
    %c0_18 = arith.constant 0 : index
    %23 = vector.load %arg13[%c0_17, %c0_18] : memref<32x128xf32, #tpu.memory_space<vmem>>, vector<32x128xf32>
    tpu.vector_store %arg13[%c0_17, %c0_18], %22 {strides = array<i32>} : memref<32x128xf32, #tpu.memory_space<vmem>>, vector<32x128xf32>,
    %24 = vector.extract_strided_slice %21 {offsets = [0, 128], sizes = [32, 128], strides = [1, 1]} : vector<32x256xf32> to vector<32x128xf32>
    %cst_19 = arith.constant 0.000000e+00 : f32
    %25 = vector.broadcast %cst_19 : f32 to vector<32x128xf32>
    %26 = arith.maximumf %24, %25 : vector<32x128xf32>
    %27 = arith.truncf %26 : vector<32x128xf32> to vector<32x128xbf16>
    %c0_20 = arith.constant 0 : index
    %c0_21 = arith.constant 0 : index
    %28 = vector.load %arg8[%c0_20, %c0_21] : memref<128x512xbf16, #tpu.memory_space<vmem>>, vector<128x512xbf16>
    %cst_22 = arith.constant dense<0.000000e+00> : vector<32x512xf32>
    %29 = tpu.matmul %27, %28, %cst_22 {dimension_numbers = #tpu.dot_dimension_numbers<[1], [0], [0], [1], [0, 0, 1, 1], [], []>} : vector<32x128xbf16>, vector<128x512xbf16>, vector<32x512xf32> -> vector<32x512xf32>
    %c0_23 = arith.constant 0 : index
    %c0_24 = arith.constant 0 : index
    %30 = vector.load %arg9[%c0_23, %c0_24] : memref<1x512xf32, #tpu.memory_space<vmem>>, vector<1x512xf32>
    %31 = vector.broadcast %30 : vector<1x512xf32> to vector<32x512xf32>
    %32 = arith.addf %29, %31 : vector<32x512xf32>
    %cst_25 = arith.constant 0.000000e+00 : f32
    %33 = vector.broadcast %cst_25 : f32 to vector<32x512xf32>
    %34 = arith.maximumf %32, %33 : vector<32x512xf32>
    %35 = arith.truncf %34 : vector<32x512xf32> to vector<32x512xbf16>
    %c0_26 = arith.constant 0 : index
    %c0_27 = arith.constant 0 : index
    %36 = vector.load %arg10[%c0_26, %c0_27] : memref<512x784xbf16, #tpu.memory_space<vmem>>, vector<512x784xbf16>
    %cst_28 = arith.constant dense<0.000000e+00> : vector<32x784xf32>
    %37 = tpu.matmul %35, %36, %cst_28 {dimension_numbers = #tpu.dot_dimension_numbers<[1], [0], [0], [1], [0, 0, 1, 1], [], []>} : vector<32x512xbf16>, vector<512x784xbf16>, vector<32x784xf32> -> vector<32x784xf32>
    %c0_29 = arith.constant 0 : index
    %c0_30 = arith.constant 0 : index
    %38 = vector.load %arg11[%c0_29, %c0_30] : memref<1x784xf32, #tpu.memory_space<vmem>>, vector<1x784xf32>
    %39 = vector.broadcast %38 : vector<1x784xf32> to vector<32x784xf32>
    %40 = arith.addf %37, %39 : vector<32x784xf32>
    %c0_31 = arith.constant 0 : index
    %c0_32 = arith.constant 0 : index
    %41 = vector.load %arg12[%c0_31, %c0_32] : memref<32x784xf32, #tpu.memory_space<vmem>>, vector<32x784xf32>
    tpu.vector_store %arg12[%c0_31, %c0_32], %40 {strides = array<i32>} : memref<32x784xf32, #tpu.memory_space<vmem>>, vector<32x784xf32>,
    return
  }
  func.func @transform_0(%arg0: i32) -> (i32, i32) {
    %c0_i32 = arith.constant 0 : i32
    %c0_i32_0 = arith.constant 0 : i32
    return %arg0, %c0_i32 : i32, i32
  }
  func.func @transform_1(%arg0: i32) -> (i32, i32) {
    %c0_i32 = arith.constant 0 : i32
    %c0_i32_0 = arith.constant 0 : i32
    %c0_i32_1 = arith.constant 0 : i32
    return %c0_i32, %c0_i32_0 : i32, i32
  }
  func.func @transform_2(%arg0: i32) -> (i32, i32) {
    %c0_i32 = arith.constant 0 : i32
    %c0_i32_0 = arith.constant 0 : i32
    %c0_i32_1 = arith.constant 0 : i32
    return %c0_i32, %c0_i32_0 : i32, i32
  }
  func.func @transform_3(%arg0: i32) -> (i32, i32) {
    %c0_i32 = arith.constant 0 : i32
    %c0_i32_0 = arith.constant 0 : i32
    %c0_i32_1 = arith.constant 0 : i32
    return %c0_i32, %c0_i32_0 : i32, i32
  }
  func.func @transform_4(%arg0: i32) -> (i32, i32) {
    %c0_i32 = arith.constant 0 : i32
    %c0_i32_0 = arith.constant 0 : i32
    %c0_i32_1 = arith.constant 0 : i32
    return %c0_i32, %c0_i32_0 : i32, i32
  }
  func.func @transform_5(%arg0: i32) -> (i32, i32) {
    %c0_i32 = arith.constant 0 : i32
    %c0_i32_0 = arith.constant 0 : i32
    %c0_i32_1 = arith.constant 0 : i32
    return %c0_i32, %c0_i32_0 : i32, i32
  }
  func.func @transform_6(%arg0: i32) -> (i32, i32) {
    %c0_i32 = arith.constant 0 : i32
    %c0_i32_0 = arith.constant 0 : i32
    %c0_i32_1 = arith.constant 0 : i32
    return %c0_i32, %c0_i32_0 : i32, i32
  }
  func.func @transform_7(%arg0: i32) -> (i32, i32) {
    %c0_i32 = arith.constant 0 : i32
    %c0_i32_0 = arith.constant 0 : i32
    %c0_i32_1 = arith.constant 0 : i32
    return %c0_i32, %c0_i32_0 : i32, i32
  }
  func.func @transform_8(%arg0: i32) -> (i32, i32) {
    %c0_i32 = arith.constant 0 : i32
    %c0_i32_0 = arith.constant 0 : i32
    %c0_i32_1 = arith.constant 0 : i32
    return %c0_i32, %c0_i32_0 : i32, i32
  }
  func.func @transform_9(%arg0: i32) -> (i32, i32) {
    %c0_i32 = arith.constant 0 : i32
    %c0_i32_0 = arith.constant 0 : i32
    %c0_i32_1 = arith.constant 0 : i32
    return %c0_i32, %c0_i32_0 : i32, i32
  }
  func.func @transform_10(%arg0: i32) -> (i32, i32) {
    %c0_i32 = arith.constant 0 : i32
    %c0_i32_0 = arith.constant 0 : i32
    %c0_i32_1 = arith.constant 0 : i32
    return %c0_i32, %c0_i32_0 : i32, i32
  }
  func.func @transform_11(%arg0: i32) -> (i32, i32) {
    %c0_i32 = arith.constant 0 : i32
    %c0_i32_0 = arith.constant 0 : i32
    return %arg0, %c0_i32 : i32, i32
  }
  func.func @transform_12(%arg0: i32) -> (i32, i32) {
    %c0_i32 = arith.constant 0 : i32
    %c0_i32_0 = arith.constant 0 : i32
    return %arg0, %c0_i32 : i32, i32
  }
}

</mosaic_0001>

<bundles_post_ra>
// kernel: _forward_jit.1
= control target key start
LH: loop header
LB: loop body
LE: loop exit
PB: predicated region body
PF: predicated region fallthrough
CT: control target
= control target key end

     0   :  { %s6618_s21 = smov 0   ;;  %s8330_s0 = inlined_call_operand.vmem [shape: bf16[64,784], index: 0, kind: input, shape index: {}]   ;;  %s8331_s1 = inlined_call_operand.vmem [shape: bf16[784,512], index: 1, kind: input, shape index: {}]   ;;  %s8332_s2 = inlined_call_operand.vmem [shape: f32[1,512], index: 2, kind: input, shape index: {}]   ;;  %s8333_s3 = inlined_call_operand.vmem [shape: bf16[512,128], index: 3, kind: input, shape index: {}]   ;;  %s8334_s4 = inlined_call_operand.vmem [shape: f32[1,128], index: 4, kind: input, shape index: {}]   ;;  %s8335_s5 = inlined_call_operand.vmem [shape: bf16[128,256], index: 5, kind: input, shape index: {}]   ;;  %s8336_s6 = inlined_call_operand.vmem [shape: f32[1,256], index: 6, kind: input, shape index: {}]   ;;  %s8337_s7 = inlined_call_operand.vmem [shape: bf16[128,512], index: 7, kind: input, shape index: {}]   ;;  %s8338_s8 = inlined_call_operand.vmem [shape: f32[1,512], index: 8, kind: input, shape index: {}]   ;;  %s8339_s9 = inlined_call_operand.vmem [shape: bf16[512,784], index: 9, kind: input, shape index: {}]   ;;  %s8340_s10 = inlined_call_operand.vmem [shape: f32[1,784], index: 10, kind: input, shape index: {}]   ;;  %s8341_s11 = inlined_call_operand.vmem [shape: f32[64,784], index: 11, kind: output, shape index: {0}]   ;;  %s8342_s12 = inlined_call_operand.vmem [shape: f32[64,128], index: 12, kind: output, shape index: {1}]  }
   0x1 LB: > { %s5039_s22 = sadd.s32 4294967295, %s6550_s21   ;;  %p5043_p0 = scmp.ge.s32.totalorder %s6550_s21, 1  ;;  %s6550_s21 = sphi %s6618_s21, %s23_s21  }
   0x2   : > { %p367_p1 = scmp.lt.s32.totalorder %s6550_s21, 3 }
   0x4   : > { %p368_p2 = pnand %p5043_p0, %p367_p1 }
   0x5   : > { %v5806_v0 = vld [vmem:[%s8331_s1 + $0x4] ss:$16 sps:$4 sm:$0xff] (!%p368_p2)   ;;  %v5808_v1 = vld [vmem:[%s8331_s1 + $0xc] ss:$16 sps:$4 sm:$0xff] (!%p368_p2)   ;;  %v5810_v2 = vld [vmem:[%s8331_s1] ss:$16 sps:$4 sm:$0xff] (!%p368_p2)  }
   0x6   : > { %371 = sbr.rel (%p368_p2) target bundleno = 1538 (0x602), region = 64  ;;  %1728 = vmatprep.subr.bf16.mxu0 (!%p368_p2), %v5806_v0  ;;  %v5811_v3 = vld [vmem:[%s8331_s1 + $0x8] ss:$16 sps:$4 sm:$0xff] (!%p368_p2)   ;;  %1940 = vmatprep.subr.bf16.mxu1 (!%p368_p2), %v5808_v1  ;;  %v5812_v4 = vld [vmem:[%s8331_s1 + $0x24] ss:$16 sps:$4 sm:$0xff] (!%p368_p2)   ;;  %s5044_s17 = sshll.u32 (!%p368_p2), %s5039_s22, 2 }
   0x7   : > { %1729 = vmatpush1.bf16.msra.mxu0 (!%p368_p2), %v5810_v2  ;;  %1941 = vmatpush1.bf16.msra.mxu1 (!%p368_p2), %v5811_v3  ;;  %v5814_v5 = vld [vmem:[%s8331_s1 + $0x2c] ss:$16 sps:$4 sm:$0xff] (!%p368_p2)   ;;  %v5816_v6 = vld [vmem:[%s8331_s1 + $0x20] ss:$16 sps:$4 sm:$0xff] (!%p368_p2)   ;;  %v5817_v7 = vld [vmem:[%s8331_s1 + $0x28] ss:$16 sps:$4 sm:$0xff] (!%p368_p2)  }
   0x8   : > { %1730 = vmatprep.subr.bf16.mxu0 (!%p368_p2), %v5812_v4  ;;  %1942 = vmatprep.subr.bf16.mxu1 (!%p368_p2), %v5814_v5  ;;  %v5818_v8 = vld [vmem:[%s8331_s1 + $0x44] ss:$16 sps:$4 sm:$0xff] (!%p368_p2)   ;;  %v5820_v9 = vld [vmem:[%s8331_s1 + $0x4c] ss:$16 sps:$4 sm:$0xff] (!%p368_p2)   ;;  %v5822_v10 = vld [vmem:[%s8331_s1 + $0x40] ss:$16 sps:$4 sm:$0xff] (!%p368_p2)  }
   0x9   : > { %v5823_v11 = vld [vmem:[%s8331_s1 + $0x48] ss:$16 sps:$4 sm:$0xff] (!%p368_p2)   ;;  %v5824_v12 = vld [vmem:[%s8331_s1 + $0x64] ss:$16 sps:$4 sm:$0xff] (!%p368_p2)   ;;  %v5826_v13 = vld [vmem:[%s8331_s1 + $0x6c] ss:$16 sps:$4 sm:$0xff] (!%p368_p2)  }
   0xa   : > { %v5828_v14 = vld [vmem:[%s8331_s1 + $0x60] ss:$16 sps:$4 sm:$0xff] (!%p368_p2)   ;;  %v5829_v15 = vld [vmem:[%s8331_s1 + $0x68] ss:$16 sps:$4 sm:$0xff] (!%p368_p2)   ;;  %v5830_v16 = vld [vmem:[%s8331_s1 + $0x84] ss:$16 sps:$4 sm:$0xff] (!%p368_p2)  }
   0xb   : > { %1731 = vmatpush1.bf16.msra.mxu0 (!%p368_p2), %v5816_v6  ;;  %1943 = vmatpush1.bf16.msra.mxu1 (!%p368_p2), %v5817_v7  ;;  %v5832_v17 = vld [vmem:[%s8331_s1 + $0x8c] ss:$16 sps:$4 sm:$0xff] (!%p368_p2)   ;;  %v5834_v18 = vld [vmem:[%s8331_s1 + $0x80] ss:$16 sps:$4 sm:$0xff] (!%p368_p2)   ;;  %v5835_v19 = vld [vmem:[%s8331_s1 + $0x88] ss:$16 sps:$4 sm:$0xff] (!%p368_p2)  }
   0xc   : > { %1732 = vmatprep.subr.bf16.mxu0 (!%p368_p2), %v5818_v8  ;;  %1944 = vmatprep.subr.bf16.mxu1 (!%p368_p2), %v5820_v9  ;;  %v5836_v20 = vld [vmem:[%s8331_s1 + $0xa4] ss:$16 sps:$4 sm:$0xff] (!%p368_p2)   ;;  %v5838_v21 = vld [vmem:[%s8331_s1 + $0xac] ss:$16 sps:$4 sm:$0xff] (!%p368_p2)   ;;  %v5840_v22 = vld [vmem:[%s8331_s1 + $0xa0] ss:$16 sps:$4 sm:$0xff] (!%p368_p2)  }
   0xd   : > { %v5841_v23 = vld [vmem:[%s8331_s1 + $0xa8] ss:$16 sps:$4 sm:$0xff]   ;;  %v5842_v24 = vld [vmem:[%s8331_s1 + $0xc4] ss:$16 sps:$4 sm:$0xff]   ;;  %v5844_v25 = vld [vmem:[%s8331_s1 + $0xcc] ss:$16 sps:$4 sm:$0xff]  }
   0xe   : > { %v5846_v26 = vld [vmem:[%s8331_s1 + $0xc0] ss:$16 sps:$4 sm:$0xff]   ;;  %v5847_v27 = vld [vmem:[%s8331_s1 + $0xc8] ss:$16 sps:$4 sm:$0xff]   ;;  %v5848_v28 = vld [vmem:[%s8331_s1 + $0xe4] ss:$16 sps:$4 sm:$0xff]  }
   0xf   : > { %1733 = vmatpush1.bf16.msra.mxu0 %v5822_v10  ;;  %1945 = vmatpush1.bf16.msra.mxu1 %v5823_v11  ;;  %v5850_v29 = vld [vmem:[%s8331_s1 + $0xec] ss:$16 sps:$4 sm:$0xff]   ;;  %v5852_v30 = vld [vmem:[%s8331_s1 + $0xe0] ss:$16 sps:$4 sm:$0xff]   ;;  %v5853_v31 = vld [vmem:[%s8331_s1 + $0xe8] ss:$16 sps:$4 sm:$0xff]  }
  0x10   : > { %1734 = vmatprep.subr.bf16.mxu0 %v5824_v12  ;;  %1946 = vmatprep.subr.bf16.mxu1 %v5826_v13  ;;  %v5854_v32 = vld [vmem:[%s8331_s1 + $0x104] ss:$16 sps:$4 sm:$0xff]   ;;  %p417_p3 = scmp.lt.s32.totalorder %s5044_s17, 7  ;;  %v5856_v33 = vld [vmem:[%s8331_s1 + $0x10c] ss:$16 sps:$4 sm:$0xff]   ;;  %vm1721_vm0 = vcmask 130048  }
  0x11   : > { %v5858_v34 = vld [vmem:[%s8331_s1 + $0x100] ss:$16 sps:$4 sm:$0xff]   ;;  %v5859_v35 = vld [vmem:[%s8331_s1 + $0x108] ss:$16 sps:$4 sm:$0xff]   ;;  %v5860_v36 = vld [vmem:[%s8331_s1 + $0x124] ss:$16 sps:$4 sm:$0xff]  }
  0x12   : > { %s8344_s17 = smov (!%p417_p3, %s5044_s17), 7  ;;  %v5862_v37 = vld [vmem:[%s8331_s1 + $0x12c] ss:$16 sps:$4 sm:$0xff]   ;;  %v5864_v38 = vld [vmem:[%s8331_s1 + $0x120] ss:$16 sps:$4 sm:$0xff]  }
  0x13   : > { %1735 = vmatpush1.bf16.msra.mxu0 %v5828_v14  ;;  %1947 = vmatpush1.bf16.msra.mxu1 %v5829_v15  ;;  %v5865_v39 = vld [vmem:[%s8331_s1 + $0x128] ss:$16 sps:$4 sm:$0xff]   ;;  %v5866_v40 = vld [vmem:[%s8331_s1 + $0x144] ss:$16 sps:$4 sm:$0xff]   ;;  %s5795_s26 = smul.u32 28, %s8344_s17  ;;  %s5049_s14 = sshll.u32 %s8344_s17, 3 }
  0x14   : > { %1736 = vmatprep.subr.bf16.mxu0 %v5830_v16  ;;  %1948 = vmatprep.subr.bf16.mxu1 %v5832_v17  ;;  %v5868_v41 = vld [vmem:[%s8331_s1 + $0x14c] ss:$16 sps:$4 sm:$0xff]   ;;  %v5870_v42 = vld [vmem:[%s8331_s1 + $0x140] ss:$16 sps:$4 sm:$0xff]   ;;  %v5871_v43 = vld [vmem:[%s8331_s1 + $0x148] ss:$16 sps:$4 sm:$0xff]   ;;  %s7541_s18 = scalar_lea.vmem %s8342_s12, %s5049_s14 }
  0x15   : > { %v5872_v44 = vld [vmem:[%s8331_s1 + $0x164] ss:$16 sps:$4 sm:$0xff]   ;;  %s6769_s19 = scalar_lea.vmem %s8330_s0, %s5795_s26  ;;  %v5874_v45 = vld [vmem:[%s8331_s1 + $0x16c] ss:$16 sps:$4 sm:$0xff]   ;;  %v5876_v46 = vld [vmem:[%s8331_s1 + $0x160] ss:$16 sps:$4 sm:$0xff]  }
  0x16   : > { %v5877_v47 = vld [vmem:[%s8331_s1 + $0x168] ss:$16 sps:$4 sm:$0xff]   ;;  %v5904_v48 = vld [vmem:[%s6769_s19 + $0x4] ss:$28 sps:$4 sm:$0xff]   ;;  %v5880_v50 = vld [vmem:[%s8331_s1 + $0x18c] ss:$16 sps:$4 sm:$0xff]  }
  0x17   : > { %1737 = vmatpush1.bf16.msra.mxu0 %v5834_v18  ;;  %1949 = vmatpush1.bf16.msra.mxu1 %v5835_v19  ;;  %v5878_v49 = vld [vmem:[%s8331_s1 + $0x184] ss:$16 sps:$4 sm:$0xff]   ;;  %v5882_v51 = vld [vmem:[%s8331_s1 + $0x180] ss:$16 sps:$4 sm:$0xff]   ;;  %v5883_v52 = vld [vmem:[%s8331_s1 + $0x188] ss:$16 sps:$4 sm:$0xff]  }
  0x18   : > { %1738 = vmatprep.subr.bf16.mxu0 %v5836_v20  ;;  %1950 = vmatprep.subr.bf16.mxu1 %v5838_v21  ;;  %v5884_v53 = vld [vmem:[%s8331_s1 + $0x1a4] ss:$16 sps:$4 sm:$0xff]   ;;  %v5886_v54 = vld [vmem:[%s8331_s1 + $0x1ac] ss:$16 sps:$4 sm:$0xff]   ;;  %v5888_v55 = vld [vmem:[%s8331_s1 + $0x1a0] ss:$16 sps:$4 sm:$0xff]  }
  0x19   : > { %1760 = vmatprep.mubr.bf16.mxu0 %v5904_v48  ;;  %1972 = vmatprep.mubr.bf16.mxu1 %v5904_v48  ;;  %v5889_v56 = vld [vmem:[%s8331_s1 + $0x1a8] ss:$16 sps:$4 sm:$0xff]   ;;  %v5890_v57 = vld [vmem:[%s8331_s1 + $0x1c4] ss:$16 sps:$4 sm:$0xff]   ;;  %v5892_v58 = vld [vmem:[%s8331_s1 + $0x1cc] ss:$16 sps:$4 sm:$0xff]  }
  0x1a   : > { %v5894_v59 = vld [vmem:[%s8331_s1 + $0x1c0] ss:$16 sps:$4 sm:$0xff]   ;;  %v5895_v60 = vld [vmem:[%s8331_s1 + $0x1c8] ss:$16 sps:$4 sm:$0xff]   ;;  %v5896_v61 = vld [vmem:[%s8331_s1 + $0x1e4] ss:$16 sps:$4 sm:$0xff]  }
  0x1b   : > { %1739 = vmatpush1.bf16.msra.mxu0 %v5840_v22  ;;  %1951 = vmatpush1.bf16.msra.mxu1 %v5841_v23  ;;  %v5898_v62 = vld [vmem:[%s8331_s1 + $0x1ec] ss:$16 sps:$4 sm:$0xff]   ;;  %v5900_v63 = vld [vmem:[%s8331_s1 + $0x1e0] ss:$16 sps:$4 sm:$0xff]   ;;  %v5901_v0 = vld [vmem:[%s8331_s1 + $0x1e8] ss:$16 sps:$4 sm:$0xff]  }
  0x1c   : > { %1740 = vmatprep.subr.bf16.mxu0 %v5842_v24  ;;  %1952 = vmatprep.subr.bf16.mxu1 %v5844_v25  ;;  %v5907_v1 = vld [vmem:[%s8331_s1 + $0x204] ss:$16 sps:$4 sm:$0xff]   ;;  %v5910_v2 = vld [vmem:[%s8331_s1 + $0x20c] ss:$16 sps:$4 sm:$0xff]   ;;  %v5905_v4 = vld [vmem:[%s8331_s1 + $0x200] ss:$16 sps:$4 sm:$0xff]  }
  0x1d   : > { %v5902_v3 = vld [vmem:[%s6769_s19] ss:$28 sps:$4 sm:$0xff]   ;;  %v5908_v5 = vld [vmem:[%s8331_s1 + $0x208] ss:$16 sps:$4 sm:$0xff]   ;;  %v5913_v6 = vld [vmem:[%s8331_s1 + $0x224] ss:$16 sps:$4 sm:$0xff]  }
  0x1e   : > { %v5916_v7 = vld [vmem:[%s8331_s1 + $0x22c] ss:$16 sps:$4 sm:$0xff]   ;;  %v5911_v8 = vld [vmem:[%s8331_s1 + $0x220] ss:$16 sps:$4 sm:$0xff]   ;;  %v5914_v9 = vld [vmem:[%s8331_s1 + $0x228] ss:$16 sps:$4 sm:$0xff]  }
  0x1f   : > { %1741 = vmatpush1.bf16.msra.mxu0 %v5846_v26  ;;  %1953 = vmatpush1.bf16.msra.mxu1 %v5847_v27  ;;  %v5919_v10 = vld [vmem:[%s8331_s1 + $0x244] ss:$16 sps:$4 sm:$0xff]   ;;  %v5922_v11 = vld [vmem:[%s8331_s1 + $0x24c] ss:$16 sps:$4 sm:$0xff]   ;;  %v5917_v12 = vld [vmem:[%s8331_s1 + $0x240] ss:$16 sps:$4 sm:$0xff]  }
  0x20   : > { %1742 = vmatprep.subr.bf16.mxu0 %v5848_v28  ;;  %1954 = vmatprep.subr.bf16.mxu1 %v5850_v29  ;;  %v5920_v13 = vld [vmem:[%s8331_s1 + $0x248] ss:$16 sps:$4 sm:$0xff]   ;;  %v5925_v14 = vld [vmem:[%s8331_s1 + $0x264] ss:$16 sps:$4 sm:$0xff]   ;;  %v5928_v15 = vld [vmem:[%s8331_s1 + $0x26c] ss:$16 sps:$4 sm:$0xff]  }
  0x21   : > { %v5923_v16 = vld [vmem:[%s8331_s1 + $0x260] ss:$16 sps:$4 sm:$0xff]   ;;  %v5926_v17 = vld [vmem:[%s8331_s1 + $0x268] ss:$16 sps:$4 sm:$0xff]   ;;  %v5931_v18 = vld [vmem:[%s8331_s1 + $0x284] ss:$16 sps:$4 sm:$0xff]  }
  0x22   : > { %v5934_v19 = vld [vmem:[%s8331_s1 + $0x28c] ss:$16 sps:$4 sm:$0xff]   ;;  %v5929_v20 = vld [vmem:[%s8331_s1 + $0x280] ss:$16 sps:$4 sm:$0xff]   ;;  %v5932_v21 = vld [vmem:[%s8331_s1 + $0x288] ss:$16 sps:$4 sm:$0xff]  }
  0x23   : > { %1743 = vmatpush1.bf16.msra.mxu0 %v5852_v30  ;;  %1955 = vmatpush1.bf16.msra.mxu1 %v5853_v31  ;;  %v5937_v22 = vld [vmem:[%s8331_s1 + $0x2a4] ss:$16 sps:$4 sm:$0xff]   ;;  %v5940_v23 = vld [vmem:[%s8331_s1 + $0x2ac] ss:$16 sps:$4 sm:$0xff]   ;;  %v5935_v25 = vld [vmem:[%s8331_s1 + $0x2a0] ss:$16 sps:$4 sm:$0xff]  }
  0x24   : > { %1744 = vmatprep.subr.bf16.mxu0 %v5854_v32  ;;  %1956 = vmatprep.subr.bf16.mxu1 %v5856_v33  ;;  %v5989_v24 = vld [vmem:[%s6769_s19 + $0x3c] ss:$28 sps:$4 sm:$0xff]   ;;  %v5943_v27 = vld [vmem:[%s8331_s1 + $0x2c4] ss:$16 sps:$4 sm:$0xff]   ;;  %v5941_v30 = vld [vmem:[%s8331_s1 + $0x2c0] ss:$16 sps:$4 sm:$0xff]  }
  0x25   : > { %v5938_v26 = vld [vmem:[%s8331_s1 + $0x2a8] ss:$16 sps:$4 sm:$0xff]   ;;  %v5946_v28 = vld [vmem:[%s8331_s1 + $0x2cc] ss:$16 sps:$4 sm:$0xff]   ;;  %v5949_v32 = vld [vmem:[%s8331_s1 + $0x2e4] ss:$16 sps:$4 sm:$0xff]  }
  0x26   : > { %v5997_v29 = vld [vmem:[%s6769_s19 + $0x38] ss:$28 sps:$4 sm:$0xff]   ;;  %v5952_v33 = vld [vmem:[%s8331_s1 + $0x2ec] ss:$16 sps:$4 sm:$0xff]   ;;  %s5796_s23 = smul.u32 56, %s8344_s17 }
  0x27   : > { %1745 = vmatpush1.bf16.msra.mxu0 %v5858_v34  ;;  %1957 = vmatpush1.bf16.msra.mxu1 %v5859_v35  ;;  %v5944_v31 = vld [vmem:[%s8331_s1 + $0x2c8] ss:$16 sps:$4 sm:$0xff]   ;;  %v5947_v35 = vld [vmem:[%s8331_s1 + $0x2e0] ss:$16 sps:$4 sm:$0xff]  }
  0x28   : > { %1746 = vmatprep.subr.bf16.mxu0 %v5860_v36  ;;  %1958 = vmatprep.subr.bf16.mxu1 %v5862_v37  ;;  %v6006_v34 = vld [vmem:[%s6769_s19 + $0xc] ss:$28 sps:$4 sm:$0xff]   ;;  %v5955_v37 = vld [vmem:[%s8331_s1 + $0x304] ss:$16 sps:$4 sm:$0xff]   ;;  %s8287_s25 = scalar_lea.vmem %s8341_s11, %s5796_s23 }
  0x29   : > { %v5950_v36 = vld [vmem:[%s8331_s1 + $0x2e8] ss:$16 sps:$4 sm:$0xff]  }
  0x2a   : > { %v5968_v48 = vld [vmem:[%s8331_s1 + $0x348] ss:$16 sps:$4 sm:$0xff]  }
  0x2b   : > { %1747 = vmatpush1.bf16.msra.mxu0 %v5864_v38  ;;  %1959 = vmatpush1.bf16.msra.mxu1 %v5865_v39  ;;  %v5958_v38 = vld [vmem:[%s8331_s1 + $0x30c] ss:$16 sps:$4 sm:$0xff]   ;;  %v5953_v39 = vld [vmem:[%s8331_s1 + $0x300] ss:$16 sps:$4 sm:$0xff]  }
  0x2c   : > { %1748 = vmatprep.subr.bf16.mxu0 %v5866_v40  ;;  %1960 = vmatprep.subr.bf16.mxu1 %v5868_v41  ;;  %v5956_v40 = vld [vmem:[%s8331_s1 + $0x308] ss:$16 sps:$4 sm:$0xff]   ;;  %v5961_v41 = vld [vmem:[%s8331_s1 + $0x324] ss:$16 sps:$4 sm:$0xff]  }
  0x2f   : > { %1749 = vmatpush1.bf16.msra.mxu0 %v5870_v42  ;;  %1961 = vmatpush1.bf16.msra.mxu1 %v5871_v43  ;;  %v5964_v42 = vld [vmem:[%s8331_s1 + $0x32c] ss:$16 sps:$4 sm:$0xff]   ;;  %v5959_v43 = vld [vmem:[%s8331_s1 + $0x320] ss:$16 sps:$4 sm:$0xff]  }
  0x30   : > { %1750 = vmatprep.subr.bf16.mxu0 %v5872_v44  ;;  %1962 = vmatprep.subr.bf16.mxu1 %v5874_v45  ;;  %v5962_v44 = vld [vmem:[%s8331_s1 + $0x328] ss:$16 sps:$4 sm:$0xff]   ;;  %v5967_v45 = vld [vmem:[%s8331_s1 + $0x344] ss:$16 sps:$4 sm:$0xff]  }
  0x33   : > { %1751 = vmatpush1.bf16.msra.mxu0 %v5876_v46  ;;  %1963 = vmatpush1.bf16.msra.mxu1 %v5877_v47  ;;  %v5970_v46 = vld [vmem:[%s8331_s1 + $0x34c] ss:$16 sps:$4 sm:$0xff]   ;;  %v5965_v47 = vld [vmem:[%s8331_s1 + $0x340] ss:$16 sps:$4 sm:$0xff]  }
  0x34   : > { %1752 = vmatprep.subr.bf16.mxu0 %v5878_v49  ;;  %1964 = vmatprep.subr.bf16.mxu1 %v5880_v50  ;;  %v5973_v49 = vld [vmem:[%s8331_s1 + $0x364] ss:$16 sps:$4 sm:$0xff]   ;;  %v5976_v50 = vld [vmem:[%s8331_s1 + $0x36c] ss:$16 sps:$4 sm:$0xff]  }
  0x37   : > { %1753 = vmatpush1.bf16.msra.mxu0 %v5882_v51  ;;  %1965 = vmatpush1.bf16.msra.mxu1 %v5883_v52  ;;  %v5971_v51 = vld [vmem:[%s8331_s1 + $0x360] ss:$16 sps:$4 sm:$0xff]   ;;  %v5974_v52 = vld [vmem:[%s8331_s1 + $0x368] ss:$16 sps:$4 sm:$0xff]  }
  0x38   : > { %1754 = vmatprep.subr.bf16.mxu0 %v5884_v53  ;;  %1966 = vmatprep.subr.bf16.mxu1 %v5886_v54  ;;  %v5979_v53 = vld [vmem:[%s8331_s1 + $0x384] ss:$16 sps:$4 sm:$0xff]   ;;  %v5982_v54 = vld [vmem:[%s8331_s1 + $0x38c] ss:$16 sps:$4 sm:$0xff]  }
  0x3b   : > { %1755 = vmatpush1.bf16.msra.mxu0 %v5888_v55  ;;  %1967 = vmatpush1.bf16.msra.mxu1 %v5889_v56  ;;  %v5977_v55 = vld [vmem:[%s8331_s1 + $0x380] ss:$16 sps:$4 sm:$0xff]   ;;  %v5980_v56 = vld [vmem:[%s8331_s1 + $0x388] ss:$16 sps:$4 sm:$0xff]  }
  0x3c   : > { %1756 = vmatprep.subr.bf16.mxu0 %v5890_v57  ;;  %1968 = vmatprep.subr.bf16.mxu1 %v5892_v58  ;;  %v5985_v57 = vld [vmem:[%s8331_s1 + $0x3a4] ss:$16 sps:$4 sm:$0xff]   ;;  %v5988_v58 = vld [vmem:[%s8331_s1 + $0x3ac] ss:$16 sps:$4 sm:$0xff]  }
  0x3f   : > { %1757 = vmatpush1.bf16.msra.mxu0 %v5894_v59  ;;  %1969 = vmatpush1.bf16.msra.mxu1 %v5895_v60  ;;  %v5983_v59 = vld [vmem:[%s8331_s1 + $0x3a0] ss:$16 sps:$4 sm:$0xff]   ;;  %v5986_v60 = vld [vmem:[%s8331_s1 + $0x3a8] ss:$16 sps:$4 sm:$0xff]  }
  0x40   : > { %1758 = vmatprep.subr.bf16.mxu0 %v5896_v61  ;;  %1970 = vmatprep.subr.bf16.mxu1 %v5898_v62  ;;  %v5993_v61 = vld [vmem:[%s8331_s1 + $0x3c4] ss:$16 sps:$4 sm:$0xff]   ;;  %v5996_v62 = vld [vmem:[%s8331_s1 + $0x3cc] ss:$16 sps:$4 sm:$0xff]  }
  0x43   : > { %1759 = vmatpush1.bf16.msra.mxu0 %v5900_v63  ;;  %1971 = vmatpush1.bf16.msra.mxu1 %v5901_v0  ;;  %v5991_v63 = vld [vmem:[%s8331_s1 + $0x3c0] ss:$16 sps:$4 sm:$0xff]   ;;  %v5994_v0 = vld [vmem:[%s8331_s1 + $0x3c8] ss:$16 sps:$4 sm:$0xff]  }
  0x44   : > { %1781 = vmatprep.subr.bf16.mxu0 %v5907_v1  ;;  %1993 = vmatprep.subr.bf16.mxu1 %v5910_v2  ;;  %v6000_v1 = vld [vmem:[%s8331_s1 + $0x3e4] ss:$16 sps:$4 sm:$0xff]   ;;  %v6003_v2 = vld [vmem:[%s8331_s1 + $0x3ec] ss:$16 sps:$4 sm:$0xff]  }
  0x46   : > { %1761 = vmatmul.mubr.bf16.vlgmr.msra.gmra.mrb[0].mxu0 %v5902_v3  ;;  %1973 = vmatmul.mubr.bf16.vlgmr.msra.gmra.mrb[0].mxu1 %v5902_v3  ;;  %v5998_v3 = vld [vmem:[%s8331_s1 + $0x3e0] ss:$16 sps:$4 sm:$0xff]  }
  0x47   : > { %1782 = vmatpush1.bf16.msra.mxu0 %v5905_v4  ;;  %1994 = vmatpush1.bf16.msra.mxu1 %v5908_v5  ;;  %v6001_v4 = vld [vmem:[%s8331_s1 + $0x3e8] ss:$16 sps:$4 sm:$0xff]   ;;  %v6009_v5 = vld [vmem:[%s8331_s1 + $0x404] ss:$16 sps:$4 sm:$0xff]  }
  0x48   : > { %1783 = vmatprep.subr.bf16.mxu0 %v5913_v6  ;;  %1995 = vmatprep.subr.bf16.mxu1 %v5916_v7  ;;  %v6012_v6 = vld [vmem:[%s8331_s1 + $0x40c] ss:$16 sps:$4 sm:$0xff]   ;;  %v6004_v7 = vld [vmem:[%s6769_s19 + $0x8] ss:$28 sps:$4 sm:$0xff]  }
  0x49   : > { %1770 = vmatprep.mubr.bf16.mxu0 %v5989_v24  ;;  %1982 = vmatprep.mubr.bf16.mxu1 %v5989_v24  ;;  %v6028_v24 = vld [vmem:[%s8331_s1 + $0x468] ss:$16 sps:$4 sm:$0xff]  }
  0x4b   : > { %1784 = vmatpush1.bf16.msra.mxu0 %v5911_v8  ;;  %1996 = vmatpush1.bf16.msra.mxu1 %v5914_v9  ;;  %v6007_v8 = vld [vmem:[%s8331_s1 + $0x400] ss:$16 sps:$4 sm:$0xff]   ;;  %v6010_v9 = vld [vmem:[%s8331_s1 + $0x408] ss:$16 sps:$4 sm:$0xff]  }
  0x4c   : > { %1785 = vmatprep.subr.bf16.mxu0 %v5919_v10  ;;  %1997 = vmatprep.subr.bf16.mxu1 %v5922_v11  ;;  %v6015_v10 = vld [vmem:[%s8331_s1 + $0x424] ss:$16 sps:$4 sm:$0xff]   ;;  %v6018_v11 = vld [vmem:[%s8331_s1 + $0x42c] ss:$16 sps:$4 sm:$0xff]  }
  0x4e   : > { %1771 = vmatmul.mubr.bf16.gmra.mrb[4].mxu0 %v5997_v29  ;;  %1983 = vmatmul.mubr.bf16.gmra.mrb[4].mxu1 %v5997_v29  ;;  %v6039_v29 = vld [vmem:[%s8331_s1 + $0x4a4] ss:$16 sps:$4 sm:$0xff]  }
  0x4f   : > { %1786 = vmatpush1.bf16.msra.mxu0 %v5917_v12  ;;  %1998 = vmatpush1.bf16.msra.mxu1 %v5920_v13  ;;  %v6091_v12 = vld [vmem:[%s6769_s19 + $0x44] ss:$28 sps:$4 sm:$0xff]  }
  0x50   : > { %1787 = vmatprep.subr.bf16.mxu0 %v5925_v14  ;;  %1999 = vmatprep.subr.bf16.mxu1 %v5928_v15  ;;  %v6013_v13 = vld [vmem:[%s8331_s1 + $0x420] ss:$16 sps:$4 sm:$0xff]   ;;  %v6016_v14 = vld [vmem:[%s8331_s1 + $0x428] ss:$16 sps:$4 sm:$0xff]   ;;  %v6021_v15 = vld [vmem:[%s8331_s1 + $0x444] ss:$16 sps:$4 sm:$0xff]  }
  0x51   : > { %1813 = vmatprep.mubr.bf16.mxu0 %v6006_v34  ;;  %2025 = vmatprep.mubr.bf16.mxu1 %v6006_v34  ;;  %v6048_v34 = vld [vmem:[%s8331_s1 + $0x4cc] ss:$16 sps:$4 sm:$0xff]  }
  0x53   : > { %1788 = vmatpush1.bf16.msra.mxu0 %v5923_v16  ;;  %2000 = vmatpush1.bf16.msra.mxu1 %v5926_v17  ;;  %v6024_v16 = vld [vmem:[%s8331_s1 + $0x44c] ss:$16 sps:$4 sm:$0xff]   ;;  %v6019_v17 = vld [vmem:[%s8331_s1 + $0x440] ss:$16 sps:$4 sm:$0xff]  }
  0x54   : > { %1789 = vmatprep.subr.bf16.mxu0 %v5931_v18  ;;  %2001 = vmatprep.subr.bf16.mxu1 %v5934_v19  ;;  %v6022_v18 = vld [vmem:[%s8331_s1 + $0x448] ss:$16 sps:$4 sm:$0xff]   ;;  %v6093_v19 = vld [vmem:[%s6769_s19 + $0x40] ss:$28 sps:$4 sm:$0xff]  }
  0x57   : > { %1790 = vmatpush1.bf16.msra.mxu0 %v5929_v20  ;;  %2002 = vmatpush1.bf16.msra.mxu1 %v5932_v21  ;;  %v6027_v20 = vld [vmem:[%s8331_s1 + $0x464] ss:$16 sps:$4 sm:$0xff]   ;;  %v6030_v21 = vld [vmem:[%s8331_s1 + $0x46c] ss:$16 sps:$4 sm:$0xff]  }
  0x58   : > { %1791 = vmatprep.subr.bf16.mxu0 %v5937_v22  ;;  %2003 = vmatprep.subr.bf16.mxu1 %v5940_v23  ;;  %v6108_v22 = vld [vmem:[%s6769_s19 + $0x14] ss:$28 sps:$4 sm:$0xff]  }
  0x59   : > { %v6025_v23 = vld [vmem:[%s8331_s1 + $0x460] ss:$16 sps:$4 sm:$0xff]  }
  0x5b   : > { %1792 = vmatpush1.bf16.msra.mxu0 %v5935_v25  ;;  %2004 = vmatpush1.bf16.msra.mxu1 %v5938_v26  ;;  %v6033_v25 = vld [vmem:[%s8331_s1 + $0x484] ss:$16 sps:$4 sm:$0xff]   ;;  %v6036_v26 = vld [vmem:[%s8331_s1 + $0x48c] ss:$16 sps:$4 sm:$0xff]  }
  0x5c   : > { %1793 = vmatprep.subr.bf16.mxu0 %v5943_v27  ;;  %2005 = vmatprep.subr.bf16.mxu1 %v5946_v28  ;;  %v6031_v27 = vld [vmem:[%s8331_s1 + $0x480] ss:$16 sps:$4 sm:$0xff]   ;;  %v6034_v28 = vld [vmem:[%s8331_s1 + $0x488] ss:$16 sps:$4 sm:$0xff]  }
  0x5f   : > { %1794 = vmatpush1.bf16.msra.mxu0 %v5941_v30  ;;  %2006 = vmatpush1.bf16.msra.mxu1 %v5944_v31  ;;  %v6042_v30 = vld [vmem:[%s8331_s1 + $0x4ac] ss:$16 sps:$4 sm:$0xff]   ;;  %v6037_v31 = vld [vmem:[%s8331_s1 + $0x4a0] ss:$16 sps:$4 sm:$0xff]  }
  0x60   : > { %1795 = vmatprep.subr.bf16.mxu0 %v5949_v32  ;;  %2007 = vmatprep.subr.bf16.mxu1 %v5952_v33  ;;  %v6040_v32 = vld [vmem:[%s8331_s1 + $0x4a8] ss:$16 sps:$4 sm:$0xff]   ;;  %v6045_v33 = vld [vmem:[%s8331_s1 + $0x4c4] ss:$16 sps:$4 sm:$0xff]  }
  0x63   : > { %1796 = vmatpush1.bf16.msra.mxu0 %v5947_v35  ;;  %2008 = vmatpush1.bf16.msra.mxu1 %v5950_v36  ;;  %v6043_v35 = vld [vmem:[%s8331_s1 + $0x4c0] ss:$16 sps:$4 sm:$0xff]   ;;  %v6046_v36 = vld [vmem:[%s8331_s1 + $0x4c8] ss:$16 sps:$4 sm:$0xff]  }
  0x64   : > { %1797 = vmatprep.subr.bf16.mxu0 %v5955_v37  ;;  %2009 = vmatprep.subr.bf16.mxu1 %v5958_v38  ;;  %v6051_v37 = vld [vmem:[%s8331_s1 + $0x4e4] ss:$16 sps:$4 sm:$0xff]   ;;  %v6054_v38 = vld [vmem:[%s8331_s1 + $0x4ec] ss:$16 sps:$4 sm:$0xff]  }
  0x67   : > { %1798 = vmatpush1.bf16.msra.mxu0 %v5953_v39  ;;  %2010 = vmatpush1.bf16.msra.mxu1 %v5956_v40  ;;  %v6049_v39 = vld [vmem:[%s8331_s1 + $0x4e0] ss:$16 sps:$4 sm:$0xff]   ;;  %v6052_v40 = vld [vmem:[%s8331_s1 + $0x4e8] ss:$16 sps:$4 sm:$0xff]  }
  0x68   : > { %1799 = vmatprep.subr.bf16.mxu0 %v5961_v41  ;;  %2011 = vmatprep.subr.bf16.mxu1 %v5964_v42  ;;  %v6057_v41 = vld [vmem:[%s8331_s1 + $0x504] ss:$16 sps:$4 sm:$0xff]   ;;  %v6060_v42 = vld [vmem:[%s8331_s1 + $0x50c] ss:$16 sps:$4 sm:$0xff]  }
  0x6b   : > { %1800 = vmatpush1.bf16.msra.mxu0 %v5959_v43  ;;  %2012 = vmatpush1.bf16.msra.mxu1 %v5962_v44  ;;  %v6055_v43 = vld [vmem:[%s8331_s1 + $0x500] ss:$16 sps:$4 sm:$0xff]   ;;  %v6058_v44 = vld [vmem:[%s8331_s1 + $0x508] ss:$16 sps:$4 sm:$0xff]  }
  0x6c   : > { %1801 = vmatprep.subr.bf16.mxu0 %v5967_v45  ;;  %2013 = vmatprep.subr.bf16.mxu1 %v5970_v46  ;;  %v6063_v45 = vld [vmem:[%s8331_s1 + $0x524] ss:$16 sps:$4 sm:$0xff]   ;;  %v6066_v46 = vld [vmem:[%s8331_s1 + $0x52c] ss:$16 sps:$4 sm:$0xff]  }
  0x6f   : > { %1802 = vmatpush1.bf16.msra.mxu0 %v5965_v47  ;;  %2014 = vmatpush1.bf16.msra.mxu1 %v5968_v48  ;;  %v6061_v47 = vld [vmem:[%s8331_s1 + $0x520] ss:$16 sps:$4 sm:$0xff]   ;;  %v6064_v48 = vld [vmem:[%s8331_s1 + $0x528] ss:$16 sps:$4 sm:$0xff]  }
  0x70   : > { %1803 = vmatprep.subr.bf16.mxu0 %v5973_v49  ;;  %2015 = vmatprep.subr.bf16.mxu1 %v5976_v50  ;;  %v6069_v49 = vld [vmem:[%s8331_s1 + $0x544] ss:$16 sps:$4 sm:$0xff]   ;;  %v6072_v50 = vld [vmem:[%s8331_s1 + $0x54c] ss:$16 sps:$4 sm:$0xff]  }
  0x73   : > { %1804 = vmatpush1.bf16.msra.mxu0 %v5971_v51  ;;  %2016 = vmatpush1.bf16.msra.mxu1 %v5974_v52  ;;  %v6067_v51 = vld [vmem:[%s8331_s1 + $0x540] ss:$16 sps:$4 sm:$0xff]   ;;  %v6070_v52 = vld [vmem:[%s8331_s1 + $0x548] ss:$16 sps:$4 sm:$0xff]  }
  0x74   : > { %1805 = vmatprep.subr.bf16.mxu0 %v5979_v53  ;;  %2017 = vmatprep.subr.bf16.mxu1 %v5982_v54  ;;  %v6075_v53 = vld [vmem:[%s8331_s1 + $0x564] ss:$16 sps:$4 sm:$0xff]   ;;  %v6078_v54 = vld [vmem:[%s8331_s1 + $0x56c] ss:$16 sps:$4 sm:$0xff]  }
  0x77   : > { %1806 = vmatpush1.bf16.msra.mxu0 %v5977_v55  ;;  %2018 = vmatpush1.bf16.msra.mxu1 %v5980_v56  ;;  %v6073_v55 = vld [vmem:[%s8331_s1 + $0x560] ss:$16 sps:$4 sm:$0xff]   ;;  %v6076_v56 = vld [vmem:[%s8331_s1 + $0x568] ss:$16 sps:$4 sm:$0xff]  }
  0x78   : > { %1807 = vmatprep.subr.bf16.mxu0 %v5985_v57  ;;  %2019 = vmatprep.subr.bf16.mxu1 %v5988_v58  ;;  %v6081_v57 = vld [vmem:[%s8331_s1 + $0x584] ss:$16 sps:$4 sm:$0xff]   ;;  %v6084_v58 = vld [vmem:[%s8331_s1 + $0x58c] ss:$16 sps:$4 sm:$0xff]  }
  0x7b   : > { %1808 = vmatpush1.bf16.msra.mxu0 %v5983_v59  ;;  %2020 = vmatpush1.bf16.msra.mxu1 %v5986_v60  ;;  %v6079_v59 = vld [vmem:[%s8331_s1 + $0x580] ss:$16 sps:$4 sm:$0xff]   ;;  %v6082_v60 = vld [vmem:[%s8331_s1 + $0x588] ss:$16 sps:$4 sm:$0xff]  }
  0x7c   : > { %1809 = vmatprep.subr.bf16.mxu0 %v5993_v61  ;;  %2021 = vmatprep.subr.bf16.mxu1 %v5996_v62  ;;  %v6087_v61 = vld [vmem:[%s8331_s1 + $0x5a4] ss:$16 sps:$4 sm:$0xff]   ;;  %v6090_v62 = vld [vmem:[%s8331_s1 + $0x5ac] ss:$16 sps:$4 sm:$0xff]  }
  0x7f   : > { %1810 = vmatpush1.bf16.msra.mxu0 %v5991_v63  ;;  %2022 = vmatpush1.bf16.msra.mxu1 %v5994_v0  ;;  %v6085_v63 = vld [vmem:[%s8331_s1 + $0x5a0] ss:$16 sps:$4 sm:$0xff]   ;;  %v6088_v0 = vld [vmem:[%s8331_s1 + $0x5a8] ss:$16 sps:$4 sm:$0xff]  }
  0x80   : > { %1811 = vmatprep.subr.bf16.mxu0 %v6000_v1  ;;  %2023 = vmatprep.subr.bf16.mxu1 %v6003_v2  ;;  %v6096_v1 = vld [vmem:[%s8331_s1 + $0x5c4] ss:$16 sps:$4 sm:$0xff]   ;;  %v6099_v2 = vld [vmem:[%s8331_s1 + $0x5cc] ss:$16 sps:$4 sm:$0xff]  }
  0x83   : > { %1812 = vmatpush1.bf16.msra.mxu0 %v5998_v3  ;;  %2024 = vmatpush1.bf16.msra.mxu1 %v6001_v4  ;;  %v6094_v3 = vld [vmem:[%s8331_s1 + $0x5c0] ss:$16 sps:$4 sm:$0xff]   ;;  %v6097_v4 = vld [vmem:[%s8331_s1 + $0x5c8] ss:$16 sps:$4 sm:$0xff]  }
  0x84   : > { %1834 = vmatprep.subr.bf16.mxu0 %v6009_v5  ;;  %2046 = vmatprep.subr.bf16.mxu1 %v6012_v6  ;;  %v6102_v5 = vld [vmem:[%s8331_s1 + $0x5e4] ss:$16 sps:$4 sm:$0xff]   ;;  %v6105_v6 = vld [vmem:[%s8331_s1 + $0x5ec] ss:$16 sps:$4 sm:$0xff]  }
  0x86   : > { %1814 = vmatmul.mubr.bf16.vlgmr.msra.gmra.mrb[0].mxu0 %v6004_v7  ;;  %2026 = vmatmul.mubr.bf16.vlgmr.msra.gmra.mrb[0].mxu1 %v6004_v7  ;;  %v6100_v7 = vld [vmem:[%s8331_s1 + $0x5e0] ss:$16 sps:$4 sm:$0xff]  }
  0x87   : > { %1835 = vmatpush1.bf16.msra.mxu0 %v6007_v8  ;;  %2047 = vmatpush1.bf16.msra.mxu1 %v6010_v9  ;;  %v6103_v8 = vld [vmem:[%s8331_s1 + $0x5e8] ss:$16 sps:$4 sm:$0xff]   ;;  %v6111_v9 = vld [vmem:[%s8331_s1 + $0x604] ss:$16 sps:$4 sm:$0xff]  }
  0x88   : > { %1836 = vmatprep.subr.bf16.mxu0 %v6015_v10  ;;  %2048 = vmatprep.subr.bf16.mxu1 %v6018_v11  ;;  %v6106_v10 = vld [vmem:[%s6769_s19 + $0x10] ss:$28 sps:$4 sm:$0xff]  }
  0x89   : > { %1823 = vmatprep.mubr.bf16.mxu0 %v6091_v12  ;;  %2035 = vmatprep.mubr.bf16.mxu1 %v6091_v12  ;;  %v6109_v11 = vld [vmem:[%s8331_s1 + $0x600] ss:$16 sps:$4 sm:$0xff]   ;;  %v6112_v12 = vld [vmem:[%s6769_s19 + $0x4c] ss:$28 sps:$4 sm:$0xff]  }
  0x8b   : > { %1837 = vmatpush1.bf16.msra.mxu0 %v6013_v13  ;;  %2049 = vmatpush1.bf16.msra.mxu1 %v6016_v14  ;;  %v6118_v13 = vld [vmem:[%s8331_s1 + $0x60c] ss:$16 sps:$4 sm:$0xff]   ;;  %v6114_v14 = vld [vmem:[%s6769_s19 + $0x48] ss:$28 sps:$4 sm:$0xff]  }
  0x8c   : > { %1838 = vmatprep.subr.bf16.mxu0 %v6021_v15  ;;  %2050 = vmatprep.subr.bf16.mxu1 %v6024_v16  ;;  %v6552_v15 = vmov 0   ;;  %v6115_v16 = vld [vmem:[%s6769_s19 + $0x18] ss:$28 sps:$4 sm:$0xff]  }
  0x8e   : > { %1824 = vmatmul.mubr.bf16.gmra.mrb[4].mxu0 %v6093_v19  ;;  %2036 = vmatmul.mubr.bf16.gmra.mrb[4].mxu1 %v6093_v19  ;;  %v6119_v19 = vld [vmem:[%s6769_s19 + $0x50] ss:$28 sps:$4 sm:$0xff]  }
  0x8f   : > { %1839 = vmatpush1.bf16.msra.mxu0 %v6019_v17  ;;  %2051 = vmatpush1.bf16.msra.mxu1 %v6022_v18  ;;  %v6116_v17 = vld [vmem:[%s8331_s1 + $0x608] ss:$16 sps:$4 sm:$0xff]   ;;  %v6120_v18 = vld [vmem:[%s8333_s3 + $0x40] sm:$0xff]  }
  0x90   : > { %1840 = vmatprep.subr.bf16.mxu0 %v6027_v20  ;;  %2052 = vmatprep.subr.bf16.mxu1 %v6030_v21  ;;  %v6121_v20 = vld [vmem:[%s8333_s3] sm:$0xff]   ;;  %v6122_v21 = vld [vmem:[%s8333_s3 + $0x48] sm:$0xff]  }
  0x91   : > { %1866 = vmatprep.mubr.bf16.mxu0 %v6108_v22  ;;  %2078 = vmatprep.mubr.bf16.mxu1 %v6108_v22  ;;  %v6123_v22 = vld [vmem:[%s8333_s3 + $0x8] sm:$0xff]  }
  0x93   : > { %1841 = vmatpush1.bf16.msra.mxu0 %v6025_v23  ;;  %2053 = vmatpush1.bf16.msra.mxu1 %v6028_v24  ;;  %v6124_v23 = vld [vmem:[%s8333_s3 + $0x50] sm:$0xff]  }
  0x94   : > { %1842 = vmatprep.subr.bf16.mxu0 %v6033_v25  ;;  %2054 = vmatprep.subr.bf16.mxu1 %v6036_v26  ;;  %v6125_v24 = vld [vmem:[%s8333_s3 + $0x10] sm:$0xff]   ;;  %v6126_v25 = vld [vmem:[%s8333_s3 + $0x58] sm:$0xff]  }
  0x95   : > { %v6127_v26 = vld [vmem:[%s8333_s3 + $0x18] sm:$0xff]  }
  0x97   : > { %1843 = vmatpush1.bf16.msra.mxu0 %v6031_v27  ;;  %2055 = vmatpush1.bf16.msra.mxu1 %v6034_v28  ;;  %v6128_v27 = vld [vmem:[%s8333_s3 + $0x60] sm:$0xff]  }
  0x98   : > { %1844 = vmatprep.subr.bf16.mxu0 %v6039_v29  ;;  %2056 = vmatprep.subr.bf16.mxu1 %v6042_v30  ;;  %v6129_v28 = vld [vmem:[%s8333_s3 + $0xc0] sm:$0xff]  }
  0x99   : > { %v6130_v29 = vld [vmem:[%s8333_s3 + $0x20] sm:$0xff]  }
  0x9a   : > { %v6131_v30 = vld [vmem:[%s8333_s3 + $0x80] sm:$0xff]  }
  0x9b   : > { %1845 = vmatpush1.bf16.msra.mxu0 %v6037_v31  ;;  %2057 = vmatpush1.bf16.msra.mxu1 %v6040_v32  ;;  %v6132_v31 = vld [vmem:[%s8333_s3 + $0x68] sm:$0xff]  }
  0x9c   : > { %1846 = vmatprep.subr.bf16.mxu0 %v6045_v33  ;;  %2058 = vmatprep.subr.bf16.mxu1 %v6048_v34  ;;  %v6133_v32 = vld [vmem:[%s8333_s3 + $0xc8] sm:$0xff]  }
  0x9d   : > { %v6134_v33 = vld [vmem:[%s8333_s3 + $0x28] sm:$0xff]  }
  0x9e   : > { %v6135_v34 = vld [vmem:[%s8333_s3 + $0x88] sm:$0xff]  }
  0x9f   : > { %1847 = vmatpush1.bf16.msra.mxu0 %v6043_v35  ;;  %2059 = vmatpush1.bf16.msra.mxu1 %v6046_v36  ;;  %v6136_v35 = vld [vmem:[%s8333_s3 + $0x70] sm:$0xff]  }
  0xa0   : > { %1848 = vmatprep.subr.bf16.mxu0 %v6051_v37  ;;  %2060 = vmatprep.subr.bf16.mxu1 %v6054_v38  ;;  %v6137_v36 = vld [vmem:[%s8333_s3 + $0xd0] sm:$0xff]  }
  0xa1   : > { %v6138_v37 = vld [vmem:[%s8333_s3 + $0x30] sm:$0xff]  }
  0xa2   : > { %v6139_v38 = vld [vmem:[%s8333_s3 + $0x90] sm:$0xff]  }
  0xa3   : > { %1849 = vmatpush1.bf16.msra.mxu0 %v6049_v39  ;;  %2061 = vmatpush1.bf16.msra.mxu1 %v6052_v40  ;;  %v6140_v39 = vld [vmem:[%s8333_s3 + $0x78] sm:$0xff]  }
  0xa4   : > { %1850 = vmatprep.subr.bf16.mxu0 %v6057_v41  ;;  %2062 = vmatprep.subr.bf16.mxu1 %v6060_v42  ;;  %v6141_v40 = vld [vmem:[%s8333_s3 + $0xd8] sm:$0xff]  }
  0xa5   : > { %v6142_v41 = vld [vmem:[%s8333_s3 + $0x38] sm:$0xff]  }
  0xa6   : > { %v6143_v42 = vld [vmem:[%s8333_s3 + $0x98] sm:$0xff]  }
  0xa7   : > { %1851 = vmatpush1.bf16.msra.mxu0 %v6055_v43  ;;  %2063 = vmatpush1.bf16.msra.mxu1 %v6058_v44  ;;  %v6144_v43 = vld [vmem:[%s8333_s3 + $0xe0] sm:$0xff]  }
  0xa8   : > { %1852 = vmatprep.subr.bf16.mxu0 %v6063_v45  ;;  %2064 = vmatprep.subr.bf16.mxu1 %v6066_v46  ;;  %v6145_v44 = vld [vmem:[%s8333_s3 + $0xa0] sm:$0xff]   ;;  %v6146_v45 = vld [vmem:[%s8333_s3 + $0xe8] sm:$0xff]  }
  0xa9   : > { %v6147_v46 = vld [vmem:[%s8333_s3 + $0xa8] sm:$0xff]  }
  0xab   : > { %1853 = vmatpush1.bf16.msra.mxu0 %v6061_v47  ;;  %2065 = vmatpush1.bf16.msra.mxu1 %v6064_v48  ;;  %v6148_v47 = vld [vmem:[%s8333_s3 + $0xf0] sm:$0xff]  }
  0xac   : > { %1854 = vmatprep.subr.bf16.mxu0 %v6069_v49  ;;  %2066 = vmatprep.subr.bf16.mxu1 %v6072_v50  ;;  %v6149_v48 = vld [vmem:[%s8333_s3 + $0xb0] sm:$0xff]   ;;  %v6150_v49 = vld [vmem:[%s8333_s3 + $0xf8] sm:$0xff]  }
  0xad   : > { %v6151_v50 = vld [vmem:[%s8333_s3 + $0xb8] sm:$0xff]  }
  0xaf   : > { %1855 = vmatpush1.bf16.msra.mxu0 %v6067_v51  ;;  %2067 = vmatpush1.bf16.msra.mxu1 %v6070_v52  ;;  %v6154_v51 = vld [vmem:[%s8335_s5 + $0x4] ss:$8 sps:$4 sm:$0xff]  }
  0xb0   : > { %1856 = vmatprep.subr.bf16.mxu0 %v6075_v53  ;;  %2068 = vmatprep.subr.bf16.mxu1 %v6078_v54 }
  0xb3   : > { %1857 = vmatpush1.bf16.msra.mxu0 %v6073_v55  ;;  %2069 = vmatpush1.bf16.msra.mxu1 %v6076_v56  ;;  %v651_v55 = vlaneseq }
  0xb4   : > { %1858 = vmatprep.subr.bf16.mxu0 %v6081_v57  ;;  %2070 = vmatprep.subr.bf16.mxu1 %v6084_v58 }
  0xb5   : > { %v7345_v57 = vshrl.u32 %v651_v55, 7 }
  0xb7   : > { %1859 = vmatpush1.bf16.msra.mxu0 %v6079_v59  ;;  %2071 = vmatpush1.bf16.msra.mxu1 %v6082_v60  ;;  %v7352_v60 = vsub.s32 0, %v7345_v57 }
  0xb8   : > { %1860 = vmatprep.subr.bf16.mxu0 %v6087_v61  ;;  %2072 = vmatprep.subr.bf16.mxu1 %v6090_v62  ;;  %v7357_v62 = vsub.s32 1, %v7345_v57 }
  0xbb   : > { %1861 = vmatpush1.bf16.msra.mxu0 %v6085_v63  ;;  %2073 = vmatpush1.bf16.msra.mxu1 %v6088_v0  ;;  %v649_v0 = vld [vmem:[%s8332_s2] sm:$0xf] }
  0xbc   : > { %1862 = vmatprep.subr.bf16.mxu0 %v6096_v1  ;;  %2074 = vmatprep.subr.bf16.mxu1 %v6099_v2  ;;  %v654_v1 = vrot.slane %v649_v0, %v7352_v60  ;;  %v658_v2 = vrot.slane %v649_v0, %v7357_v62 }
  0xbf   : > { %1863 = vmatpush1.bf16.msra.mxu0 %v6094_v3  ;;  %2075 = vmatpush1.bf16.msra.mxu1 %v6097_v4 }
  0xc0   : > { %1864 = vmatprep.subr.bf16.mxu0 %v6102_v5  ;;  %2076 = vmatprep.subr.bf16.mxu1 %v6105_v6 }
  0xc3   : > { %1865 = vmatpush1.bf16.msra.mxu0 %v6100_v7  ;;  %2077 = vmatpush1.bf16.msra.mxu1 %v6103_v8 }
  0xc4   : > { %1887 = vmatprep.subr.bf16.mxu0 %v6111_v9  ;;  %5599 = vmatprep.subr.bf16.mxu1 %v6129_v28 }
  0xc6   : > { %1867 = vmatmul.mubr.bf16.vlgmr.msra.gmra.mrb[0].mxu0 %v6106_v10  ;;  %2079 = vmatmul.mubr.bf16.vlgmr.msra.gmra.mrb[0].mxu1 %v6106_v10 }
  0xc7   : > { %1888 = vmatpush1.bf16.msra.mxu0 %v6109_v11  ;;  %1876 = vmatprep.mubr.bf16.mxu0 %v6112_v12 }
  0xc8   : > { %2088 = vmatprep.mubr.bf16.mxu1 %v6112_v12  ;;  %2099 = vmatprep.subr.bf16.mxu0 %v6118_v13 }
  0xc9   : > { %5600 = vmatpush3.bf16.msra.mxu1 %v6131_v30 }
  0xca   : > { %5601 = vmatprep.subr.bf16.mxu1 %v6133_v32 }
  0xcd   : > { %5602 = vmatpush3.bf16.msra.mxu1 %v6135_v34 }
  0xce   : > { %1877 = vmatmul.mubr.bf16.gmra.mrb[4].mxu0 %v6114_v14  ;;  %2089 = vmatmul.mubr.bf16.gmra.mrb[4].mxu1 %v6114_v14 }
  0xcf   : > { %1919 = vmatprep.mubr.bf16.mxu0 %v6552_v15  ;;  %5603 = vmatprep.subr.bf16.mxu1 %v6137_v36 }
  0xd1   : > { %5604 = vmatpush3.bf16.msra.mxu1 %v6139_v38 }
  0xd2   : > { %5605 = vmatprep.subr.bf16.mxu1 %v6141_v40 }
  0xd5   : > { %5606 = vmatpush3.bf16.msra.mxu1 %v6143_v42 }
  0xd6   : > { %5260 = vmatmul.mubr.msk.bf16.vlgmr.msra.gmra.mrb[0].mxu0 %vm1721_vm0, %v6115_v16  ;;  %5607 = vmatprep.subr.bf16.mxu1 %v6144_v43 }
  0xd7   : > { %2100 = vmatpush1.bf16.msra.mxu0 %v6116_v17  ;;  %1929 = vmatprep.mubr.bf16.mxu0 %v6552_v15 }
  0xd8   : > { %5571 = vmatprep.subr.bf16.mxu0 %v6120_v18  ;;  %v7370_v18 = vsub.s32 3, %v7345_v57 }
  0xd9   : > { %5608 = vmatpush3.bf16.msra.mxu1 %v6145_v44 }
  0xda   : > { %5609 = vmatprep.subr.bf16.mxu1 %v6146_v45 }
  0xdd   : > { %5610 = vmatpush3.bf16.msra.mxu1 %v6147_v46 }
  0xde   : > { %5261 = vmatmul.mubr.msk.bf16.gmra.mrb[4].mxu0 %vm1721_vm0, %v6119_v19  ;;  %5611 = vmatprep.subr.bf16.mxu1 %v6148_v47 }
  0xdf   : > { %2131 = vmatprep.mubr.bf16.mxu0 %v6552_v15 }
  0xe1   : > { %5612 = vmatpush3.bf16.msra.mxu1 %v6149_v48 }
  0xe2   : > { %5613 = vmatprep.subr.bf16.mxu1 %v6150_v49 }
  0xe5   : > { %5614 = vmatpush3.bf16.msra.mxu1 %v6151_v50 }
  0xe6   : > { %5262 = vmatmul.mubr.msk.bf16.vlgmr.msra.gmra.mrb[8].mxu0 %vm1721_vm0, %v6115_v16  ;;  %v7367_v16 = vsub.s32 2, %v7345_v57 }
  0xe7   : > { %2141 = vmatprep.mubr.bf16.mxu0 %v6552_v15  ;;  %5572 = vmatpush3.bf16.msra.mxu0 %v6121_v20 }
  0xe8   : > { %5573 = vmatprep.subr.bf16.mxu0 %v6122_v21  ;;  %v6152_v21 = vld [vmem:[%s8335_s5] ss:$8 sps:$4 sm:$0xff]  }
  0xeb   : > { %5574 = vmatpush3.bf16.msra.mxu0 %v6123_v22 }
  0xec   : > { %5575 = vmatprep.subr.bf16.mxu0 %v6124_v23 }
  0xee   : > { %5263 = vmatmul.mubr.msk.bf16.gmra.mrb[12].mxu0 %vm1721_vm0, %v6119_v19 }
  0xef   : > { %5576 = vmatpush3.bf16.msra.mxu0 %v6125_v24 }
  0xf0   : > { %5577 = vmatprep.subr.bf16.mxu0 %v6126_v25 }
  0xf3   : > { %5578 = vmatpush3.bf16.msra.mxu0 %v6127_v26  ;;  %v662_v26 = vrot.slane %v649_v0, %v7367_v16 }
  0xf4   : > { %5579 = vmatprep.subr.bf16.mxu0 %v6128_v27 }
  0xf7   : > { %5580 = vmatpush3.bf16.msra.mxu0 %v6130_v29  ;;  %v666_v29 = vrot.slane %v649_v0, %v7370_v18 }
  0xf8   : > { %5581 = vmatprep.subr.bf16.mxu0 %v6132_v31 }
  0xfb   : > { %5582 = vmatpush3.bf16.msra.mxu0 %v6134_v33 }
  0xfc   : > { %5583 = vmatprep.subr.bf16.mxu0 %v6136_v35 }
  0xff   : > { %5584 = vmatpush3.bf16.msra.mxu0 %v6138_v37 }
 0x100   : > { %5585 = vmatprep.subr.bf16.mxu0 %v6140_v39 }
 0x103   : > { %5586 = vmatpush3.bf16.msra.mxu0 %v6142_v41 }
 0x104   : > { %2651 = vmatprep.subr.bf16.mxu0 %v6154_v51 }
 0x199   : > { %v2080_v52 = vpop.f32.mrb[0].mxu1 }
 0x19a   : > { %v2082_v53 = vpop.f32.mrb[1].mxu1  ;;  %v5691_v35 = vadd.f32 %v2080_v52, %v662_v26 }
 0x19b   : > { %v2084_v54 = vpop.f32.mrb[2].mxu1  ;;  %v5693_v37 = vadd.f32 %v2082_v53, %v666_v29 }
 0x19c   : > { %v2086_v56 = vpop.f32.mrb[3].mxu1  ;;  %v5695_v40 = vadd.f32 %v2084_v54, %v662_v26 }
 0x19d   : > { %v5697_v43 = vadd.f32 %v2086_v56, %v666_v29 }
 0x1a1   : > { %v7347_v58 = vpop.f32.mrb[4].mxu1 }
 0x1a2   : > { %v7349_v59 = vpop.f32.mrb[5].mxu1  ;;  %v5699_v53 = vadd.f32 %v7347_v58, %v662_v26 }
 0x1a3   : > { %v7354_v61 = vpop.f32.mrb[6].mxu1  ;;  %v5701_v54 = vadd.f32 %v7349_v59, %v666_v29 }
 0x1a4   : > { %v7359_v63 = vpop.f32.mrb[7].mxu1 }
 0x1a9   : > { %v1921_v3 = vpop.f32.mrb[0].mxu0 }
 0x1aa   : > { %v5683_v4 = vadd.f32 %v1921_v3, %v654_v1  ;;  %v1923_v5 = vpop.f32.mrb[1].mxu0 }
 0x1ab   : > { %v5684_v6 = vadd.f32 %v1923_v5, %v658_v2  ;;  %v1925_v7 = vpop.f32.mrb[2].mxu0 }
 0x1ac   : > { %v5685_v8 = vadd.f32 %v1925_v7, %v654_v1  ;;  %v1927_v9 = vpop.f32.mrb[3].mxu0  ;;  %v2152_v11 = vmax.f32 %v5683_v4, 0.0  ;;  %v5705_v4 = vadd.f32 %v7359_v63, %v666_v29  ;;  %v6155_v63 = vld [vmem:[%s8335_s5 + $0x10] ss:$8 sps:$4 sm:$0xff]  }
 0x1ad   : > { %v5686_v10 = vadd.f32 %v1927_v9, %v658_v2  ;;  %v2153_v13 = vmax.f32 %v5684_v6, 0.0  ;;  %v6176_v29 = vld [vmem:[%s8337_s7] ss:$16 sps:$4 sm:$0xff]  }
 0x1ae   : > { %v2156_v12 = vmax.f32 %v5685_v8, 0.0 }
 0x1af   : > { %v2157_v14 = vmax.f32 %v5686_v10, 0.0 }
 0x1b0   : > { %v2168_v17 = vpack.c.bf16 %v2156_v12, %v2152_v11 }
 0x1b1   : > { %v2169_v19 = vpack.c.bf16 %v2157_v14, %v2153_v13  ;;  %v1931_v20 = vpop.f32.mrb[4].mxu0  ;;  %v6160_v14 = vld [vmem:[%s8335_s5 + $0x24] ss:$8 sps:$4 sm:$0xff]  }
 0x1b2   : > { %v5687_v22 = vadd.f32 %v1931_v20, %v654_v1  ;;  %v1933_v23 = vpop.f32.mrb[5].mxu0  ;;  %v6161_v20 = vld [vmem:[%s8335_s5 + $0x30] ss:$8 sps:$4 sm:$0xff]  }
 0x1b3   : > { %v5688_v24 = vadd.f32 %v1933_v23, %v658_v2  ;;  %v1935_v25 = vpop.f32.mrb[6].mxu0  ;;  %2471 = vmatprep.mubr.bf16.mxu0 %v2169_v19  ;;  %v6163_v19 = vld [vmem:[%s8335_s5 + $0x34] ss:$8 sps:$4 sm:$0xff]  }
 0x1b4   : > { %v5689_v27 = vadd.f32 %v1935_v25, %v654_v1  ;;  %v1937_v28 = vpop.f32.mrb[7].mxu0  ;;  %2472 = vmatmul.mubr.bf16.vlgmr.msra.gmra.mrb[16].mxu0 %v2168_v17  ;;  %v2160_v31 = vmax.f32 %v5687_v22, 0.0  ;;  %v5703_v1 = vadd.f32 %v7354_v61, %v662_v26  ;;  %v6157_v61 = vld [vmem:[%s8335_s5 + $0x14] ss:$8 sps:$4 sm:$0xff]   ;;  %v6158_v17 = vld [vmem:[%s8335_s5 + $0x20] ss:$8 sps:$4 sm:$0xff]  }
 0x1b5   : > { %v5690_v30 = vadd.f32 %v1937_v28, %v658_v2  ;;  %2652 = vmatpush1.bf16.msra.mxu0 %v6152_v21  ;;  %v2161_v33 = vmax.f32 %v5688_v24, 0.0  ;;  %v6166_v21 = vld [vmem:[%s8335_s5 + $0x44] ss:$8 sps:$4 sm:$0xff]   ;;  %v6164_v22 = vld [vmem:[%s8335_s5 + $0x40] ss:$8 sps:$4 sm:$0xff]  }
 0x1b6   : > { %v2164_v32 = vmax.f32 %v5689_v27, 0.0  ;;  %2653 = vmatprep.subr.bf16.mxu0 %v6157_v61  ;;  %v6169_v23 = vld [vmem:[%s8335_s5 + $0x54] ss:$8 sps:$4 sm:$0xff]   ;;  %v6167_v24 = vld [vmem:[%s8335_s5 + $0x50] ss:$8 sps:$4 sm:$0xff]  }
 0x1b7   : > { %v2165_v34 = vmax.f32 %v5690_v30, 0.0  ;;  %v6172_v25 = vld [vmem:[%s8335_s5 + $0x64] ss:$8 sps:$4 sm:$0xff]   ;;  %v6170_v26 = vld [vmem:[%s8335_s5 + $0x60] ss:$8 sps:$4 sm:$0xff]  }
 0x1b8   : > { %v2172_v36 = vpack.c.bf16 %v2164_v32, %v2160_v31  ;;  %v6175_v27 = vld [vmem:[%s8335_s5 + $0x74] ss:$8 sps:$4 sm:$0xff]   ;;  %v6173_v28 = vld [vmem:[%s8335_s5 + $0x70] ss:$8 sps:$4 sm:$0xff]  }
 0x1b9   : > { %v2173_v38 = vpack.c.bf16 %v2165_v34, %v2161_v33  ;;  %v2133_v39 = vpop.f32.mrb[8].mxu0  ;;  %2654 = vmatpush1.bf16.msra.mxu0 %v6155_v63  ;;  %v6178_v30 = vld [vmem:[%s8337_s7 + $0x4] ss:$16 sps:$4 sm:$0xff]   ;;  %v6181_v31 = vld [vmem:[%s8337_s7 + $0xc] ss:$16 sps:$4 sm:$0xff]  }
 0x1ba   : > { %v5692_v41 = vadd.f32 %v5691_v35, %v2133_v39  ;;  %v2135_v42 = vpop.f32.mrb[9].mxu0  ;;  %2655 = vmatprep.subr.bf16.mxu0 %v6160_v14  ;;  %v6184_v32 = vld [vmem:[%s8337_s7 + $0x24] ss:$16 sps:$4 sm:$0xff]   ;;  %2928 = vmatprep.subr.bf16.mxu1 %v6178_v30  ;;  %v6182_v33 = vld [vmem:[%s8337_s7 + $0x20] ss:$16 sps:$4 sm:$0xff]  }
 0x1bb   : > { %v5694_v44 = vadd.f32 %v5693_v37, %v2135_v42  ;;  %v2137_v45 = vpop.f32.mrb[10].mxu0  ;;  %2479 = vmatprep.mubr.bf16.mxu0 %v2173_v38  ;;  %v6190_v34 = vld [vmem:[%s8337_s7 + $0x44] ss:$16 sps:$4 sm:$0xff]   ;;  %v6188_v35 = vld [vmem:[%s8337_s7 + $0x40] ss:$16 sps:$4 sm:$0xff]  }
 0x1bc   : > { %v5696_v46 = vadd.f32 %v5695_v40, %v2137_v45  ;;  %v2139_v47 = vpop.f32.mrb[11].mxu0  ;;  %2480 = vmatmul.mubr.bf16.gmra.mrb[20].mxu0 %v2172_v36  ;;  %v2154_v49 = vmax.f32 %v5692_v41, 0.0  ;;  %v6196_v36 = vld [vmem:[%s8337_s7 + $0x64] ss:$16 sps:$4 sm:$0xff]   ;;  %v6194_v37 = vld [vmem:[%s8337_s7 + $0x60] ss:$16 sps:$4 sm:$0xff]  }
 0x1bd   : > { %v5698_v48 = vadd.f32 %v5697_v43, %v2139_v47  ;;  %2683 = vmatprep.mubr.bf16.mxu0 %v6552_v15  ;;  %v2155_v51 = vmax.f32 %v5694_v44, 0.0  ;;  %2656 = vmatpush1.bf16.msra.mxu0 %v6158_v17  ;;  %v6202_v38 = vld [vmem:[%s8337_s7 + $0x84] ss:$16 sps:$4 sm:$0xff]   ;;  %v6200_v39 = vld [vmem:[%s8337_s7 + $0x80] ss:$16 sps:$4 sm:$0xff]  }
 0x1be   : > { %v2158_v50 = vmax.f32 %v5696_v46, 0.0  ;;  %2657 = vmatprep.subr.bf16.mxu0 %v6163_v19  ;;  %v6208_v40 = vld [vmem:[%s8337_s7 + $0xa4] ss:$16 sps:$4 sm:$0xff]   ;;  %v6206_v41 = vld [vmem:[%s8337_s7 + $0xa0] ss:$16 sps:$4 sm:$0xff]  }
 0x1bf   : > { %v2159_v52 = vmax.f32 %v5698_v48, 0.0  ;;  %v6187_v63 = vld [vmem:[%s8337_s7 + $0x2c] ss:$16 sps:$4 sm:$0xff]  }
 0x1c0   : > { %v2170_v55 = vpack.c.bf16 %v2158_v50, %v2154_v49  ;;  %v6205_v30 = vld [vmem:[%s8337_s7 + $0x8c] ss:$16 sps:$4 sm:$0xff]  }
 0x1c1   : > { %v2171_v0 = vpack.c.bf16 %v2159_v52, %v2155_v51  ;;  %v2143_v56 = vpop.f32.mrb[12].mxu0  ;;  %2658 = vmatpush1.bf16.msra.mxu0 %v6161_v20 }
 0x1c2   : > { %v5700_v2 = vadd.f32 %v5699_v53, %v2143_v56  ;;  %v2145_v3 = vpop.f32.mrb[13].mxu0  ;;  %2659 = vmatprep.subr.bf16.mxu0 %v6166_v21  ;;  %v6185_v21 = vld [vmem:[%s8337_s7 + $0x28] ss:$16 sps:$4 sm:$0xff]  }
 0x1c3   : > { %v5702_v5 = vadd.f32 %v5701_v54, %v2145_v3  ;;  %v2147_v6 = vpop.f32.mrb[14].mxu0  ;;  %2520 = vmatprep.mubr.bf16.mxu1 %v2171_v0 }
 0x1c4   : > { %v5704_v7 = vadd.f32 %v5703_v1, %v2147_v6  ;;  %v2149_v8 = vpop.f32.mrb[15].mxu0  ;;  %2521 = vmatmul.mubr.bf16.vlgmr.msra.gmra.mrb[8].mxu1 %v2170_v55  ;;  %v2162_v10 = vmax.f32 %v5700_v2, 0.0  ;;  %v5264_v55 = vld [vmem:[%s8334_s4] ss:$0 sm:$0xff] }
 0x1c5   : > { %v5706_v9 = vadd.f32 %v5705_v4, %v2149_v8  ;;  %v2163_v11 = vmax.f32 %v5702_v5, 0.0  ;;  %2660 = vmatpush1.bf16.msra.mxu0 %v6164_v22  ;;  %2929 = vmatpush1.bf16.msra.mxu1 %v6176_v29  ;;  %v6197_v29 = vld [vmem:[%s8337_s7 + $0x68] ss:$16 sps:$4 sm:$0xff]  }
 0x1c6   : > { %v2166_v58 = vmax.f32 %v5704_v7, 0.0  ;;  %2661 = vmatprep.subr.bf16.mxu0 %v6169_v23  ;;  %2930 = vmatprep.subr.bf16.mxu1 %v6184_v32  ;;  %v6193_v23 = vld [vmem:[%s8337_s7 + $0x4c] ss:$16 sps:$4 sm:$0xff]  }
 0x1c7   : > { %v2167_v12 = vmax.f32 %v5706_v9, 0.0  ;;  %v6211_v32 = vld [vmem:[%s8337_s7 + $0xac] ss:$16 sps:$4 sm:$0xff]  }
 0x1c8   : > { %v2174_v59 = vpack.c.bf16 %v2166_v58, %v2162_v10 }
 0x1c9   : > { %v2175_v13 = vpack.c.bf16 %v2167_v12, %v2163_v11  ;;  %2662 = vmatpush1.bf16.msra.mxu0 %v6167_v24  ;;  %2931 = vmatpush1.bf16.msra.mxu1 %v6182_v33  ;;  %v6179_v11 = vld [vmem:[%s8337_s7 + $0x8] ss:$16 sps:$4 sm:$0xff]  }
 0x1ca   : > { %2663 = vmatprep.subr.bf16.mxu0 %v6172_v25  ;;  %2932 = vmatprep.subr.bf16.mxu1 %v6190_v34  ;;  %v6209_v33 = vld [vmem:[%s8337_s7 + $0xa8] ss:$16 sps:$4 sm:$0xff]   ;;  %v6214_v34 = vld [vmem:[%s8337_s7 + $0xc4] ss:$16 sps:$4 sm:$0xff]  }
 0x1cb   : > { %2528 = vmatprep.mubr.bf16.mxu1 %v2175_v13 }
 0x1cc   : > { %2529 = vmatmul.mubr.bf16.gmra.mrb[12].mxu1 %v2174_v59 }
 0x1cd   : > { %2960 = vmatprep.mubr.bf16.mxu1 %v6552_v15  ;;  %2664 = vmatpush1.bf16.msra.mxu0 %v6170_v26  ;;  %v6191_v26 = vld [vmem:[%s8337_s7 + $0x48] ss:$16 sps:$4 sm:$0xff]  }
 0x1ce   : > { %2665 = vmatprep.subr.bf16.mxu0 %v6175_v27  ;;  %2933 = vmatpush1.bf16.msra.mxu1 %v6188_v35  ;;  %v6217_v35 = vld [vmem:[%s8337_s7 + $0xcc] ss:$16 sps:$4 sm:$0xff]  }
 0x1cf   : > { %2934 = vmatprep.subr.bf16.mxu1 %v6196_v36  ;;  %v6212_v36 = vld [vmem:[%s8337_s7 + $0xc0] ss:$16 sps:$4 sm:$0xff]  }
 0x1d1   : > { %2666 = vmatpush1.bf16.msra.mxu0 %v6173_v28  ;;  %v6199_v28 = vld [vmem:[%s8337_s7 + $0x6c] ss:$16 sps:$4 sm:$0xff]  }
 0x1d2   : > { %2981 = vmatprep.subr.bf16.mxu0 %v6181_v31  ;;  %2935 = vmatpush1.bf16.msra.mxu1 %v6194_v37  ;;  %v6203_v31 = vld [vmem:[%s8337_s7 + $0x88] ss:$16 sps:$4 sm:$0xff]  }
 0x1d3   : > { %2936 = vmatprep.subr.bf16.mxu1 %v6202_v38  ;;  %v6215_v37 = vld [vmem:[%s8337_s7 + $0xc8] ss:$16 sps:$4 sm:$0xff]   ;;  %v6220_v38 = vld [vmem:[%s8337_s7 + $0xe4] ss:$16 sps:$4 sm:$0xff]  }
 0x1d6   : > { %2937 = vmatpush1.bf16.msra.mxu1 %v6200_v39  ;;  %v6223_v39 = vld [vmem:[%s8337_s7 + $0xec] ss:$16 sps:$4 sm:$0xff]  }
 0x1d7   : > { %2938 = vmatprep.subr.bf16.mxu1 %v6208_v40  ;;  %v6218_v40 = vld [vmem:[%s8337_s7 + $0xe0] ss:$16 sps:$4 sm:$0xff]  }
 0x1da   : > { %2939 = vmatpush1.bf16.msra.mxu1 %v6206_v41  ;;  %v6221_v41 = vld [vmem:[%s8337_s7 + $0xe8] ss:$16 sps:$4 sm:$0xff]  }
 0x1db   : > { %2940 = vmatprep.subr.bf16.mxu1 %v6214_v34  ;;  %v6260_v34 = vld [vmem:[%s8339_s9 + $0x150] ss:$28 sps:$4 sm:$0xff]  }
 0x1de   : > { %2941 = vmatpush1.bf16.msra.mxu1 %v6212_v36  ;;  %v6268_v36 = vld [vmem:[%s8339_s9 + $0x18c] ss:$28 sps:$4 sm:$0xff]  }
 0x1df   : > { %2942 = vmatprep.subr.bf16.mxu1 %v6220_v38  ;;  %v6266_v38 = vld [vmem:[%s8339_s9 + $0x188] ss:$28 sps:$4 sm:$0xff]  }
 0x1e2   : > { %2943 = vmatpush1.bf16.msra.mxu1 %v6218_v40  ;;  %v6274_v40 = vld [vmem:[%s8339_s9 + $0x1c4] ss:$28 sps:$4 sm:$0xff]  }
 0x287   : > { %v5587_v42 = vpop.f32.mrb[16].mxu0 }
 0x288   : > { %v5588_v43 = vpop.f32.mrb[17].mxu0 }
 0x289   : > { %v5589_v44 = vadd.f32 %v5588_v43, %v5587_v42  ;;  %v5590_v45 = vpop.f32.mrb[18].mxu0  ;;  %v6226_v42 = vld [vmem:[%s8339_s9 + $0x4] ss:$28 sps:$4 sm:$0xff]   ;;  %v6229_v43 = vld [vmem:[%s8339_s9 + $0xc] ss:$28 sps:$4 sm:$0xff]  }
 0x28a   : > { %v5591_v46 = vpop.f32.mrb[19].mxu0  ;;  %4503 = vmatprep.subr.bf16.mxu1 %v6226_v42  ;;  %v6272_v42 = vld [vmem:[%s8339_s9 + $0x1c0] ss:$28 sps:$4 sm:$0xff]  }
 0x28b   : > { %v5592_v47 = vadd.f32 %v5591_v46, %v5590_v45  ;;  %v2474_v56 = vadd.f32 %v5589_v44, %v5264_v55  ;;  %v2559_v44 = vld [vmem:[%s8336_s6] sm:$0x3] }
 0x28c   : > { %v2564_v45 = vrot.slane %v2559_v44, %v7352_v60  ;;  %v2568_v46 = vrot.slane %v2559_v44, %v7357_v62  ;;  %v6280_v44 = vld [vmem:[%s8339_s9 + $0x1fc] ss:$28 sps:$4 sm:$0xff]  }
 0x28d   : > { %v2477_v4 = vadd.f32 %v5592_v47, %v5264_v55 }
 0x28f   : > { %v5593_v48 = vpop.f32.mrb[20].mxu0 }
 0x290   : > { %v5594_v49 = vpop.f32.mrb[21].mxu0 }
 0x291   : > { %v5595_v50 = vadd.f32 %v5594_v49, %v5593_v48  ;;  %v5596_v51 = vpop.f32.mrb[22].mxu0 }
 0x292   : > { %v5597_v52 = vpop.f32.mrb[23].mxu0 }
 0x293   : > { %v5598_v53 = vadd.f32 %v5597_v52, %v5596_v51  ;;  %v2482_v12 = vadd.f32 %v5595_v50, %v5264_v55 }
 0x295   : > { %v2485_v17 = vadd.f32 %v5598_v53, %v5264_v55 }
 0x297   : > { %v5615_v54 = vpop.f32.mrb[8].mxu1 }
 0x298   : > { %v5616_v0 = vpop.f32.mrb[9].mxu1 }
 0x299   : > { %v5617_v1 = vadd.f32 %v5616_v0, %v5615_v54  ;;  %v5618_v2 = vpop.f32.mrb[10].mxu1 }
 0x29a   : > { %v5619_v3 = vpop.f32.mrb[11].mxu1 }
 0x29b   : > { %v2523_v5 = vadd.f32 %v5617_v1, %v2474_v56  ;;  %v5620_v6 = vadd.f32 %v5619_v3, %v5618_v2  ;;  %v6224_v2 = vld [vmem:[%s8339_s9] ss:$28 sps:$4 sm:$0xff]   ;;  %v6227_v3 = vld [vmem:[%s8339_s9 + $0x8] ss:$28 sps:$4 sm:$0xff]  }
 0x29d   : > { %v2526_v7 = vadd.f32 %v5620_v6, %v2477_v4  ;;  %v2537_v8 = vmax.f32 %v2523_v5, 0.0  ;;  %v6232_v6 = vld [vmem:[%s8339_s9 + $0x3c] ss:$28 sps:$4 sm:$0xff]  }
 0x29f   : > { %v2538_v9 = vmax.f32 %v2526_v7, 0.0  ;;  %v5621_v10 = vpop.f32.mrb[12].mxu1  ;;  %v6235_v7 = vld [vmem:[%s8339_s9 + $0x44] ss:$28 sps:$4 sm:$0xff]  }
 0x2a0   : > { %v5622_v58 = vpop.f32.mrb[13].mxu1 }
 0x2a1   : > { %v2541_v59 = vpack.c.bf16 %v2538_v9, %v2537_v8  ;;  %v5623_v13 = vadd.f32 %v5622_v58, %v5621_v10  ;;  %v5624_v61 = vpop.f32.mrb[14].mxu1 }
 0x2a2   : > { %v5625_v14 = vpop.f32.mrb[15].mxu1 }
 0x2a3   : > { %v2531_v19 = vadd.f32 %v5623_v13, %v2482_v12  ;;  %v5626_v20 = vadd.f32 %v5625_v14, %v5624_v61  ;;  %2684 = vmatmul.mubr.bf16.vlgmr.msra.gmra.mrb[24].mxu0 %v2541_v59  ;;  %v6230_v12 = vld [vmem:[%s8339_s9 + $0x38] ss:$28 sps:$4 sm:$0xff]   ;;  %v6233_v59 = vld [vmem:[%s8339_s9 + $0x40] ss:$28 sps:$4 sm:$0xff]  }
 0x2a4   : > { %2693 = vmatprep.mubr.bf16.mxu0 %v6552_v15  ;;  %2982 = vmatpush1.bf16.msra.mxu0 %v6179_v11  ;;  %v6238_v13 = vld [vmem:[%s8339_s9 + $0x74] ss:$28 sps:$4 sm:$0xff]  }
 0x2a5   : > { %v2534_v22 = vadd.f32 %v5626_v20, %v2485_v17  ;;  %2983 = vmatprep.subr.bf16.mxu0 %v6187_v63  ;;  %v2539_v24 = vmax.f32 %v2531_v19, 0.0  ;;  %v6236_v17 = vld [vmem:[%s8339_s9 + $0x70] ss:$28 sps:$4 sm:$0xff]   ;;  %v6239_v19 = vld [vmem:[%s8339_s9 + $0x78] ss:$28 sps:$4 sm:$0xff]  }
 0x2a6   : > { %v6244_v20 = vld [vmem:[%s8339_s9 + $0xac] ss:$28 sps:$4 sm:$0xff]  }
 0x2a7   : > { %v2540_v25 = vmax.f32 %v2534_v22, 0.0  ;;  %v6242_v22 = vld [vmem:[%s8339_s9 + $0xa8] ss:$28 sps:$4 sm:$0xff]  }
 0x2a8   : > { %2984 = vmatpush1.bf16.msra.mxu0 %v6185_v21  ;;  %v6247_v21 = vld [vmem:[%s8339_s9 + $0xb4] ss:$28 sps:$4 sm:$0xff]  }
 0x2a9   : > { %v2542_v27 = vpack.c.bf16 %v2540_v25, %v2539_v24  ;;  %2985 = vmatprep.subr.bf16.mxu0 %v6193_v23  ;;  %v6245_v23 = vld [vmem:[%s8339_s9 + $0xb0] ss:$28 sps:$4 sm:$0xff]   ;;  %v6250_v24 = vld [vmem:[%s8339_s9 + $0xe4] ss:$28 sps:$4 sm:$0xff]  }
 0x2aa   : > { %v6253_v25 = vld [vmem:[%s8339_s9 + $0xec] ss:$28 sps:$4 sm:$0xff]  }
 0x2ab   : > { %2694 = vmatmul.mubr.bf16.gmra.mrb[28].mxu0 %v2542_v27  ;;  %v6251_v27 = vld [vmem:[%s8339_s9 + $0xe8] ss:$28 sps:$4 sm:$0xff]  }
 0x2ac   : > { %2986 = vmatpush1.bf16.msra.mxu0 %v6191_v26  ;;  %3013 = vmatprep.mubr.bf16.mxu0 %v6552_v15  ;;  %v6248_v26 = vld [vmem:[%s8339_s9 + $0xe0] ss:$28 sps:$4 sm:$0xff]  }
 0x2ad   : > { %2987 = vmatprep.subr.bf16.mxu0 %v6199_v28  ;;  %v6256_v28 = vld [vmem:[%s8339_s9 + $0x11c] ss:$28 sps:$4 sm:$0xff]  }
 0x2b0   : > { %2988 = vmatpush1.bf16.msra.mxu0 %v6197_v29  ;;  %v6259_v29 = vld [vmem:[%s8339_s9 + $0x124] ss:$28 sps:$4 sm:$0xff]  }
 0x2b1   : > { %2989 = vmatprep.subr.bf16.mxu0 %v6205_v30  ;;  %v6254_v30 = vld [vmem:[%s8339_s9 + $0x118] ss:$28 sps:$4 sm:$0xff]  }
 0x2b4   : > { %2990 = vmatpush1.bf16.msra.mxu0 %v6203_v31  ;;  %v6257_v31 = vld [vmem:[%s8339_s9 + $0x120] ss:$28 sps:$4 sm:$0xff]  }
 0x2b5   : > { %2991 = vmatprep.subr.bf16.mxu0 %v6211_v32  ;;  %v6262_v32 = vld [vmem:[%s8339_s9 + $0x154] ss:$28 sps:$4 sm:$0xff]  }
 0x2b8   : > { %2992 = vmatpush1.bf16.msra.mxu0 %v6209_v33  ;;  %v6265_v33 = vld [vmem:[%s8339_s9 + $0x15c] ss:$28 sps:$4 sm:$0xff]  }
 0x2b9   : > { %2993 = vmatprep.subr.bf16.mxu0 %v6217_v35  ;;  %v6263_v35 = vld [vmem:[%s8339_s9 + $0x158] ss:$28 sps:$4 sm:$0xff]  }
 0x2bc   : > { %2994 = vmatpush1.bf16.msra.mxu0 %v6215_v37  ;;  %v6271_v37 = vld [vmem:[%s8339_s9 + $0x194] ss:$28 sps:$4 sm:$0xff]  }
 0x2bd   : > { %2995 = vmatprep.subr.bf16.mxu0 %v6223_v39  ;;  %v6269_v39 = vld [vmem:[%s8339_s9 + $0x190] ss:$28 sps:$4 sm:$0xff]  }
 0x2c0   : > { %2996 = vmatpush1.bf16.msra.mxu0 %v6221_v41  ;;  %v6277_v41 = vld [vmem:[%s8339_s9 + $0x1cc] ss:$28 sps:$4 sm:$0xff]  }
 0x2c1   : > { %4609 = vmatprep.subr.bf16.mxu0 %v6229_v43  ;;  %v6275_v43 = vld [vmem:[%s8339_s9 + $0x1c8] ss:$28 sps:$4 sm:$0xff]  }
 0x376   : > { %v2685_v47 = vpop.f32.mrb[24].mxu0 }
 0x377   : > { %v2686_v48 = vadd.f32 %v2685_v47, %v2564_v45  ;;  %v2687_v49 = vpop.f32.mrb[25].mxu0  ;;  %v6281_v47 = vld [vmem:[%s8339_s9 + $0x200] ss:$28 sps:$4 sm:$0xff]  }
 0x378   : > { %v2688_v50 = vadd.f32 %v2687_v49, %v2568_v46  ;;  %v2689_v51 = vpop.f32.mrb[26].mxu0  ;;  %v6289_v49 = vld [vmem:[%s8339_s9 + $0x23c] ss:$28 sps:$4 sm:$0xff]  }
 0x379   : > { %2704 = vst [vmem:[%s7541_s18] sm:$0xff] %v2686_v48  ;;  %v2690_v52 = vadd.f32 %v2689_v51, %v2564_v45  ;;  %v2691_v53 = vpop.f32.mrb[27].mxu0  ;;  %v6286_v48 = vld [vmem:[%s8339_s9 + $0x234] ss:$28 sps:$4 sm:$0xff]  }
 0x37a   : > { %v2692_v55 = vadd.f32 %v2691_v53, %v2568_v46  ;;  %v2708_v54 = vmax.f32 %v2688_v50, 0.0  ;;  %v6284_v50 = vld [vmem:[%s8339_s9 + $0x230] ss:$28 sps:$4 sm:$0xff]   ;;  %v6287_v51 = vld [vmem:[%s8339_s9 + $0x238] ss:$28 sps:$4 sm:$0xff]  }
 0x37b   : > { %2705 = vst [vmem:[%s7541_s18 + $0x8] sm:$0xff] %v2690_v52  ;;  %v6292_v52 = vld [vmem:[%s8339_s9 + $0x26c] ss:$28 sps:$4 sm:$0xff]   ;;  %v6295_v53 = vld [vmem:[%s8339_s9 + $0x274] ss:$28 sps:$4 sm:$0xff]  }
 0x37c   : > { %v2709_v0 = vmax.f32 %v2692_v55, 0.0  ;;  %v6290_v55 = vld [vmem:[%s8339_s9 + $0x268] ss:$28 sps:$4 sm:$0xff]  }
 0x37e   : > { %v2712_v56 = vpack.c.bf16 %v2709_v0, %v2708_v54  ;;  %v2695_v1 = vpop.f32.mrb[28].mxu0  ;;  %v6293_v54 = vld [vmem:[%s8339_s9 + $0x270] ss:$28 sps:$4 sm:$0xff]   ;;  %v6298_v0 = vld [vmem:[%s8339_s9 + $0x2a4] ss:$28 sps:$4 sm:$0xff]  }
 0x37f   : > { %v2696_v4 = vadd.f32 %v2695_v1, %v2564_v45  ;;  %v2697_v5 = vpop.f32.mrb[29].mxu0  ;;  %v6296_v1 = vld [vmem:[%s8339_s9 + $0x2a0] ss:$28 sps:$4 sm:$0xff]  }
 0x380   : > { %v2698_v8 = vadd.f32 %v2697_v5, %v2568_v46  ;;  %v2699_v9 = vpop.f32.mrb[30].mxu0  ;;  %2961 = vmatmul.mubr.bf16.vlgmr.msra.gmra.mrb[16].mxu1 %v2712_v56  ;;  %3014 = vmatmul.mubr.bf16.vlgmr.msra.gmra.mrb[32].mxu0 %v2712_v56  ;;  %v6301_v56 = vld [vmem:[%s8339_s9 + $0x2ac] ss:$28 sps:$4 sm:$0xff]   ;;  %v6302_v5 = vld [vmem:[%s8339_s9 + $0x2d8] ss:$28 sps:$4 sm:$0xff]  }
 0x381   : > { %2706 = vst [vmem:[%s7541_s18 + $0x10] sm:$0xff] %v2696_v4  ;;  %v2700_v10 = vadd.f32 %v2699_v9, %v2564_v45  ;;  %v2701_v58 = vpop.f32.mrb[31].mxu0  ;;  %2970 = vmatprep.mubr.bf16.mxu1 %v6552_v15  ;;  %3023 = vmatprep.mubr.bf16.mxu0 %v6552_v15  ;;  %v6241_v15 = vld [vmem:[%s8339_s9 + $0x7c] ss:$28 sps:$4 sm:$0xff]   ;;  %v6283_v45 = vld [vmem:[%s8339_s9 + $0x204] ss:$28 sps:$4 sm:$0xff]  }
 0x382   : > { %v2702_v11 = vadd.f32 %v2701_v58, %v2568_v46  ;;  %4504 = vmatpush1.bf16.msra.mxu1 %v6224_v2  ;;  %4610 = vmatpush1.bf16.msra.mxu0 %v6227_v3  ;;  %v2710_v61 = vmax.f32 %v2698_v8, 0.0  ;;  %v6278_v46 = vld [vmem:[%s8339_s9 + $0x1f8] ss:$28 sps:$4 sm:$0xff]   ;;  %v6299_v2 = vld [vmem:[%s8339_s9 + $0x2a8] ss:$28 sps:$4 sm:$0xff]  }
 0x383   : > { %2707 = vst [vmem:[%s7541_s18 + $0x18] sm:$0xff] %v2700_v10  ;;  %4505 = vmatprep.subr.bf16.mxu1 %v6232_v6  ;;  %4611 = vmatprep.subr.bf16.mxu0 %v6235_v7  ;;  %v6304_v3 = vld [vmem:[%s8339_s9 + $0x2dc] ss:$28 sps:$4 sm:$0xff]   ;;  %v6307_v4 = vld [vmem:[%s8339_s9 + $0x2e4] ss:$28 sps:$4 sm:$0xff]  }
 0x384   : > { %v2711_v63 = vmax.f32 %v2702_v11, 0.0  ;;  %v6305_v6 = vld [vmem:[%s8339_s9 + $0x2e0] ss:$28 sps:$4 sm:$0xff]   ;;  %v6310_v7 = vld [vmem:[%s8339_s9 + $0x314] ss:$28 sps:$4 sm:$0xff]  }
 0x385   : > { %v6313_v8 = vld [vmem:[%s8339_s9 + $0x31c] ss:$28 sps:$4 sm:$0xff]   ;;  %v6308_v9 = vld [vmem:[%s8339_s9 + $0x310] ss:$28 sps:$4 sm:$0xff]  }
 0x386   : > { %v2713_v14 = vpack.c.bf16 %v2711_v63, %v2710_v61  ;;  %4506 = vmatpush1.bf16.msra.mxu1 %v6230_v12  ;;  %4612 = vmatpush1.bf16.msra.mxu0 %v6233_v59  ;;  %v6311_v10 = vld [vmem:[%s8339_s9 + $0x318] ss:$28 sps:$4 sm:$0xff]   ;;  %v6316_v58 = vld [vmem:[%s8339_s9 + $0x34c] ss:$28 sps:$4 sm:$0xff]   ;;  %v2746_v61 = vld [vmem:[%s8338_s8] sm:$0xf] }
 0x387   : > { %4507 = vmatprep.subr.bf16.mxu1 %v6238_v13  ;;  %4613 = vmatprep.subr.bf16.mxu0 %v6241_v15  ;;  %v6319_v11 = vld [vmem:[%s8339_s9 + $0x354] ss:$28 sps:$4 sm:$0xff]   ;;  %v6314_v12 = vld [vmem:[%s8339_s9 + $0x348] ss:$28 sps:$4 sm:$0xff]   ;;  %v2751_v63 = vrot.slane %v2746_v61, %v7352_v60 }
 0x388   : > { %2971 = vmatmul.mubr.bf16.gmra.mrb[20].mxu1 %v2713_v14  ;;  %3024 = vmatmul.mubr.bf16.gmra.mrb[36].mxu0 %v2713_v14  ;;  %v6317_v59 = vld [vmem:[%s8339_s9 + $0x350] ss:$28 sps:$4 sm:$0xff]   ;;  %v6322_v13 = vld [vmem:[%s8339_s9 + $0x384] ss:$28 sps:$4 sm:$0xff]   ;;  %v2759_v14 = vrot.slane %v2746_v61, %v7367_v16 }
 0x389   : > { %v6325_v15 = vld [vmem:[%s8339_s9 + $0x38c] ss:$28 sps:$4 sm:$0xff]  }
 0x38a   : > { %4508 = vmatpush1.bf16.msra.mxu1 %v6236_v17  ;;  %4614 = vmatpush1.bf16.msra.mxu0 %v6239_v19  ;;  %v2755_v17 = vrot.slane %v2746_v61, %v7357_v62  ;;  %v2763_v19 = vrot.slane %v2746_v61, %v7370_v18 }
 0x38b   : > { %4509 = vmatprep.subr.bf16.mxu1 %v6244_v20  ;;  %4615 = vmatprep.subr.bf16.mxu0 %v6247_v21 }
 0x38e   : > { %4510 = vmatpush1.bf16.msra.mxu1 %v6242_v22  ;;  %4616 = vmatpush1.bf16.msra.mxu0 %v6245_v23 }
 0x38f   : > { %4511 = vmatprep.subr.bf16.mxu1 %v6250_v24  ;;  %4617 = vmatprep.subr.bf16.mxu0 %v6253_v25 }
 0x392   : > { %4512 = vmatpush1.bf16.msra.mxu1 %v6248_v26  ;;  %4618 = vmatpush1.bf16.msra.mxu0 %v6251_v27 }
 0x393   : > { %4513 = vmatprep.subr.bf16.mxu1 %v6256_v28  ;;  %4619 = vmatprep.subr.bf16.mxu0 %v6259_v29 }
 0x396   : > { %4514 = vmatpush1.bf16.msra.mxu1 %v6254_v30  ;;  %4620 = vmatpush1.bf16.msra.mxu0 %v6257_v31 }
 0x397   : > { %4515 = vmatprep.subr.bf16.mxu1 %v6262_v32  ;;  %4621 = vmatprep.subr.bf16.mxu0 %v6265_v33 }
 0x39a   : > { %4516 = vmatpush1.bf16.msra.mxu1 %v6260_v34  ;;  %4622 = vmatpush1.bf16.msra.mxu0 %v6263_v35 }
 0x39b   : > { %4517 = vmatprep.subr.bf16.mxu1 %v6268_v36  ;;  %4623 = vmatprep.subr.bf16.mxu0 %v6271_v37 }
 0x39e   : > { %4518 = vmatpush1.bf16.msra.mxu1 %v6266_v38  ;;  %4624 = vmatpush1.bf16.msra.mxu0 %v6269_v39 }
 0x39f   : > { %4519 = vmatprep.subr.bf16.mxu1 %v6274_v40  ;;  %4625 = vmatprep.subr.bf16.mxu0 %v6277_v41 }
 0x3a2   : > { %4520 = vmatpush1.bf16.msra.mxu1 %v6272_v42  ;;  %4626 = vmatpush1.bf16.msra.mxu0 %v6275_v43 }
 0x3a3   : > { %4521 = vmatprep.subr.bf16.mxu1 %v6280_v44  ;;  %4627 = vmatprep.subr.bf16.mxu0 %v6283_v45 }
 0x3a6   : > { %4522 = vmatpush1.bf16.msra.mxu1 %v6278_v46  ;;  %4628 = vmatpush1.bf16.msra.mxu0 %v6281_v47 }
 0x3a7   : > { %4523 = vmatprep.subr.bf16.mxu1 %v6286_v48  ;;  %4629 = vmatprep.subr.bf16.mxu0 %v6289_v49 }
 0x3aa   : > { %4524 = vmatpush1.bf16.msra.mxu1 %v6284_v50  ;;  %4630 = vmatpush1.bf16.msra.mxu0 %v6287_v51  ;;  %v6320_v50 = vld [vmem:[%s8339_s9 + $0x380] ss:$28 sps:$4 sm:$0xff]   ;;  %v6323_v51 = vld [vmem:[%s8339_s9 + $0x388] ss:$28 sps:$4 sm:$0xff]  }
 0x3ab   : > { %4525 = vmatprep.subr.bf16.mxu1 %v6292_v52  ;;  %4631 = vmatprep.subr.bf16.mxu0 %v6295_v53 }
 0x3ae   : > { %4526 = vmatpush1.bf16.msra.mxu1 %v6290_v55  ;;  %4632 = vmatpush1.bf16.msra.mxu0 %v6293_v54 }
 0x3af   : > { %4527 = vmatprep.subr.bf16.mxu1 %v6298_v0  ;;  %4633 = vmatprep.subr.bf16.mxu0 %v6301_v56  ;;  %v6328_v0 = vld [vmem:[%s8339_s9 + $0x3bc] ss:$28 sps:$4 sm:$0xff]   ;;  %v6331_v56 = vld [vmem:[%s8339_s9 + $0x3c4] ss:$28 sps:$4 sm:$0xff]  }
 0x3b2   : > { %4528 = vmatpush1.bf16.msra.mxu1 %v6296_v1  ;;  %4634 = vmatpush1.bf16.msra.mxu0 %v6299_v2 }
 0x3b3   : > { %4529 = vmatprep.subr.bf16.mxu1 %v6304_v3  ;;  %4635 = vmatprep.subr.bf16.mxu0 %v6307_v4 }
 0x3b6   : > { %4530 = vmatpush1.bf16.msra.mxu1 %v6302_v5  ;;  %4636 = vmatpush1.bf16.msra.mxu0 %v6305_v6 }
 0x3b7   : > { %4531 = vmatprep.subr.bf16.mxu1 %v6310_v7  ;;  %4637 = vmatprep.subr.bf16.mxu0 %v6313_v8 }
 0x3ba   : > { %4532 = vmatpush1.bf16.msra.mxu1 %v6308_v9  ;;  %4638 = vmatpush1.bf16.msra.mxu0 %v6311_v10 }
 0x3bb   : > { %4533 = vmatprep.subr.bf16.mxu1 %v6316_v58  ;;  %4639 = vmatprep.subr.bf16.mxu0 %v6319_v11  ;;  %v6326_v58 = vld [vmem:[%s8339_s9 + $0x3b8] ss:$28 sps:$4 sm:$0xff]   ;;  %v6329_v11 = vld [vmem:[%s8339_s9 + $0x3c0] ss:$28 sps:$4 sm:$0xff]  }
 0x3be   : > { %4534 = vmatpush1.bf16.msra.mxu1 %v6314_v12  ;;  %4640 = vmatpush1.bf16.msra.mxu0 %v6317_v59  ;;  %v6334_v12 = vld [vmem:[%s8339_s9 + $0x3f4] ss:$28 sps:$4 sm:$0xff]  }
 0x3bf   : > { %4556 = vmatprep.subr.bf16.mxu1 %v6322_v13  ;;  %4662 = vmatprep.subr.bf16.mxu0 %v6325_v15 }
 0x453   : > { %v2962_v20 = vpop.f32.mrb[16].mxu1  ;;  %v3015_v21 = vpop.f32.mrb[32].mxu0 }
 0x454   : > { %v2963_v22 = vadd.f32 %v2962_v20, %v2751_v63  ;;  %v3016_v23 = vadd.f32 %v3015_v21, %v2759_v14  ;;  %v2964_v24 = vpop.f32.mrb[17].mxu1  ;;  %v3017_v25 = vpop.f32.mrb[33].mxu0 }
 0x455   : > { %v2965_v26 = vadd.f32 %v2964_v24, %v2755_v17  ;;  %v3018_v27 = vadd.f32 %v3017_v25, %v2763_v19  ;;  %v2966_v28 = vpop.f32.mrb[18].mxu1  ;;  %v3019_v29 = vpop.f32.mrb[34].mxu0  ;;  %v6332_v25 = vld [vmem:[%s8339_s9 + $0x3f0] ss:$28 sps:$4 sm:$0xff]  }
 0x456   : > { %v2967_v30 = vadd.f32 %v2966_v28, %v2751_v63  ;;  %v3020_v31 = vadd.f32 %v3019_v29, %v2759_v14  ;;  %v2968_v32 = vpop.f32.mrb[19].mxu1  ;;  %v3021_v33 = vpop.f32.mrb[35].mxu0  ;;  %v3034_v36 = vmax.f32 %v2963_v22, 0.0  ;;  %v3036_v37 = vmax.f32 %v3016_v23, 0.0  ;;  %v6343_v28 = vld [vmem:[%s8339_s9 + $0x434] ss:$28 sps:$4 sm:$0xff]  }
 0x457   : > { %v2969_v34 = vadd.f32 %v2968_v32, %v2755_v17  ;;  %v3022_v35 = vadd.f32 %v3021_v33, %v2763_v19  ;;  %v3035_v40 = vmax.f32 %v2965_v26, 0.0  ;;  %v3037_v41 = vmax.f32 %v3018_v27, 0.0  ;;  %v6335_v26 = vld [vmem:[%s8339_s9 + $0x3f8] ss:$28 sps:$4 sm:$0xff]   ;;  %v6340_v27 = vld [vmem:[%s8339_s9 + $0x42c] ss:$28 sps:$4 sm:$0xff]  }
 0x458   : > { %v3038_v38 = vmax.f32 %v2967_v30, 0.0  ;;  %v3040_v39 = vmax.f32 %v3020_v31, 0.0  ;;  %v6338_v29 = vld [vmem:[%s8339_s9 + $0x428] ss:$28 sps:$4 sm:$0xff]   ;;  %v6341_v30 = vld [vmem:[%s8339_s9 + $0x430] ss:$28 sps:$4 sm:$0xff]  }
 0x459   : > { %v3039_v42 = vmax.f32 %v2969_v34, 0.0  ;;  %v3041_v43 = vmax.f32 %v3022_v35, 0.0  ;;  %v6346_v31 = vld [vmem:[%s8339_s9 + $0x464] ss:$28 sps:$4 sm:$0xff]   ;;  %v6349_v32 = vld [vmem:[%s8339_s9 + $0x46c] ss:$28 sps:$4 sm:$0xff]  }
 0x45a   : > { %v7748_v44 = vpack.c.bf16 %v3038_v38, %v3034_v36  ;;  %v7750_v45 = vpack.c.bf16 %v3040_v39, %v3036_v37  ;;  %v6344_v33 = vld [vmem:[%s8339_s9 + $0x460] ss:$28 sps:$4 sm:$0xff]   ;;  %v6347_v34 = vld [vmem:[%s8339_s9 + $0x468] ss:$28 sps:$4 sm:$0xff]   ;;  %v6350_v37 = vld [vmem:[%s8339_s9 + $0x498] ss:$28 sps:$4 sm:$0xff]  }
 0x45b   : > { %v7752_v46 = vpack.c.bf16 %v3039_v42, %v3035_v40  ;;  %v7754_v47 = vpack.c.bf16 %v3041_v43, %v3037_v41  ;;  %v2972_v48 = vpop.f32.mrb[20].mxu1  ;;  %v3025_v49 = vpop.f32.mrb[36].mxu0  ;;  %v6352_v35 = vld [vmem:[%s8339_s9 + $0x49c] ss:$28 sps:$4 sm:$0xff]   ;;  %v6355_v36 = vld [vmem:[%s8339_s9 + $0x4a4] ss:$28 sps:$4 sm:$0xff]  }
 0x45c   : > { %v2973_v52 = vadd.f32 %v2972_v48, %v2751_v63  ;;  %v3026_v53 = vadd.f32 %v3025_v49, %v2759_v14  ;;  %v2974_v55 = vpop.f32.mrb[21].mxu1  ;;  %v3027_v54 = vpop.f32.mrb[37].mxu0  ;;  %v6353_v38 = vld [vmem:[%s8339_s9 + $0x4a0] ss:$28 sps:$4 sm:$0xff]   ;;  %v6358_v39 = vld [vmem:[%s8339_s9 + $0x4d4] ss:$28 sps:$4 sm:$0xff]  }
 0x45d   : > { %v2975_v1 = vadd.f32 %v2974_v55, %v2755_v17  ;;  %v3028_v2 = vadd.f32 %v3027_v54, %v2763_v19  ;;  %v2976_v3 = vpop.f32.mrb[22].mxu1  ;;  %v3029_v4 = vpop.f32.mrb[38].mxu0  ;;  %4535 = vmatprep.mubr.bf16.mxu1 %v7752_v46  ;;  %4641 = vmatprep.mubr.bf16.mxu0 %v7752_v46  ;;  %v6361_v40 = vld [vmem:[%s8339_s9 + $0x4dc] ss:$28 sps:$4 sm:$0xff]   ;;  %v6356_v41 = vld [vmem:[%s8339_s9 + $0x4d0] ss:$28 sps:$4 sm:$0xff]  }
 0x45e   : > { %v2977_v5 = vadd.f32 %v2976_v3, %v2751_v63  ;;  %v3030_v6 = vadd.f32 %v3029_v4, %v2759_v14  ;;  %v2978_v7 = vpop.f32.mrb[23].mxu1  ;;  %v3031_v8 = vpop.f32.mrb[39].mxu0  ;;  %4536 = vmatmul.mubr.bf16.vlgmr.msra.gmra.mrb[24].mxu1 %v7748_v44  ;;  %4642 = vmatmul.mubr.bf16.vlgmr.msra.gmra.mrb[40].mxu0 %v7748_v44  ;;  %v3042_v59 = vmax.f32 %v2973_v52, 0.0  ;;  %v3044_v13 = vmax.f32 %v3026_v53, 0.0  ;;  %v6337_v63 = vld [vmem:[%s8339_s9 + $0x3fc] ss:$28 sps:$4 sm:$0xff]  }
 0x45f   : > { %v2979_v9 = vadd.f32 %v2978_v7, %v2755_v17  ;;  %v3032_v10 = vadd.f32 %v3031_v8, %v2763_v19  ;;  %4557 = vmatpush1.bf16.msra.mxu1 %v6320_v50  ;;  %4663 = vmatpush1.bf16.msra.mxu0 %v6323_v51  ;;  %v3043_v14 = vmax.f32 %v2975_v1, 0.0  ;;  %v3045_v17 = vmax.f32 %v3028_v2, 0.0  ;;  %v6359_v42 = vld [vmem:[%s8339_s9 + $0x4d8] ss:$28 sps:$4 sm:$0xff]   ;;  %v6364_v43 = vld [vmem:[%s8339_s9 + $0x50c] ss:$28 sps:$4 sm:$0xff]  }
 0x460   : > { %v3046_v15 = vmax.f32 %v2977_v5, 0.0  ;;  %v3048_v61 = vmax.f32 %v3030_v6, 0.0  ;;  %4558 = vmatprep.subr.bf16.mxu1 %v6328_v0  ;;  %4664 = vmatprep.subr.bf16.mxu0 %v6331_v56  ;;  %v6367_v48 = vld [vmem:[%s8339_s9 + $0x514] ss:$28 sps:$4 sm:$0xff]   ;;  %v6362_v49 = vld [vmem:[%s8339_s9 + $0x508] ss:$28 sps:$4 sm:$0xff]  }
 0x461   : > { %v3047_v19 = vmax.f32 %v2979_v9, 0.0  ;;  %v3049_v20 = vmax.f32 %v3032_v10, 0.0  ;;  %v6365_v50 = vld [vmem:[%s8339_s9 + $0x510] ss:$28 sps:$4 sm:$0xff]   ;;  %v6370_v51 = vld [vmem:[%s8339_s9 + $0x544] ss:$28 sps:$4 sm:$0xff]  }
 0x462   : > { %v7784_v21 = vpack.c.bf16 %v3046_v15, %v3042_v59  ;;  %v7786_v22 = vpack.c.bf16 %v3048_v61, %v3044_v13  ;;  %v6373_v52 = vld [vmem:[%s8339_s9 + $0x54c] ss:$28 sps:$4 sm:$0xff]   ;;  %v6368_v53 = vld [vmem:[%s8339_s9 + $0x540] ss:$28 sps:$4 sm:$0xff]   ;;  %v6374_v56 = vld [vmem:[%s8339_s9 + $0x578] ss:$28 sps:$4 sm:$0xff]  }
 0x463   : > { %v7788_v23 = vpack.c.bf16 %v3047_v19, %v3043_v14  ;;  %v7790_v24 = vpack.c.bf16 %v3049_v20, %v3045_v17  ;;  %4559 = vmatpush1.bf16.msra.mxu1 %v6326_v58  ;;  %4665 = vmatpush1.bf16.msra.mxu0 %v6329_v11  ;;  %v6371_v55 = vld [vmem:[%s8339_s9 + $0x548] ss:$28 sps:$4 sm:$0xff]   ;;  %v6376_v54 = vld [vmem:[%s8339_s9 + $0x57c] ss:$28 sps:$4 sm:$0xff]   ;;  %v6382_v2 = vld [vmem:[%s8339_s9 + $0x5b4] ss:$28 sps:$4 sm:$0xff]  }
 0x464   : > { %4560 = vmatprep.subr.bf16.mxu1 %v6334_v12  ;;  %4666 = vmatprep.subr.bf16.mxu0 %v6337_v63  ;;  %v6379_v0 = vld [vmem:[%s8339_s9 + $0x584] ss:$28 sps:$4 sm:$0xff]   ;;  %v6385_v3 = vld [vmem:[%s8339_s9 + $0x5bc] ss:$28 sps:$4 sm:$0xff]   ;;  %v6380_v4 = vld [vmem:[%s8339_s9 + $0x5b0] ss:$28 sps:$4 sm:$0xff]  }
 0x465   : > { %4545 = vmatprep.mubr.bf16.mxu1 %v7788_v23  ;;  %4651 = vmatprep.mubr.bf16.mxu0 %v7788_v23  ;;  %v6377_v1 = vld [vmem:[%s8339_s9 + $0x580] ss:$28 sps:$4 sm:$0xff]   ;;  %v6383_v5 = vld [vmem:[%s8339_s9 + $0x5b8] ss:$28 sps:$4 sm:$0xff]   ;;  %v6388_v6 = vld [vmem:[%s8339_s9 + $0x5ec] ss:$28 sps:$4 sm:$0xff]  }
 0x466   : > { %4546 = vmatmul.mubr.bf16.gmra.mrb[28].mxu1 %v7784_v21  ;;  %4652 = vmatmul.mubr.bf16.gmra.mrb[44].mxu0 %v7784_v21  ;;  %v6391_v7 = vld [vmem:[%s8339_s9 + $0x5f4] ss:$28 sps:$4 sm:$0xff]   ;;  %v6386_v8 = vld [vmem:[%s8339_s9 + $0x5e8] ss:$28 sps:$4 sm:$0xff]   ;;  %v6392_v11 = vld [vmem:[%s8339_s9 + $0x620] ss:$28 sps:$4 sm:$0xff]  }
 0x467   : > { %4561 = vmatpush1.bf16.msra.mxu1 %v6332_v25  ;;  %4667 = vmatpush1.bf16.msra.mxu0 %v6335_v26  ;;  %v6389_v9 = vld [vmem:[%s8339_s9 + $0x5f0] ss:$28 sps:$4 sm:$0xff]   ;;  %v6394_v10 = vld [vmem:[%s8339_s9 + $0x624] ss:$28 sps:$4 sm:$0xff]   ;;  %v6400_v59 = vld [vmem:[%s8339_s9 + $0x65c] ss:$28 sps:$4 sm:$0xff]  }
 0x468   : > { %4588 = vmatprep.mubr.bf16.mxu1 %v7754_v47  ;;  %4694 = vmatprep.mubr.bf16.mxu0 %v7754_v47  ;;  %v6397_v58 = vld [vmem:[%s8339_s9 + $0x62c] ss:$28 sps:$4 sm:$0xff]   ;;  %v6403_v13 = vld [vmem:[%s8339_s9 + $0x664] ss:$28 sps:$4 sm:$0xff]   ;;  %v6398_v15 = vld [vmem:[%s8339_s9 + $0x658] ss:$28 sps:$4 sm:$0xff]  }
 0x469   : > { %4562 = vmatprep.subr.bf16.mxu1 %v6340_v27  ;;  %4668 = vmatprep.subr.bf16.mxu0 %v6343_v28  ;;  %v6395_v12 = vld [vmem:[%s8339_s9 + $0x628] ss:$28 sps:$4 sm:$0xff]   ;;  %v6401_v61 = vld [vmem:[%s8339_s9 + $0x660] ss:$28 sps:$4 sm:$0xff]   ;;  %v6406_v63 = vld [vmem:[%s8339_s9 + $0x694] ss:$28 sps:$4 sm:$0xff]  }
 0x46a   : > { %v6409_v14 = vld [vmem:[%s8339_s9 + $0x69c] ss:$28 sps:$4 sm:$0xff]   ;;  %v6404_v17 = vld [vmem:[%s8339_s9 + $0x690] ss:$28 sps:$4 sm:$0xff]   ;;  %v6410_v26 = vld [vmem:[%s8339_s9 + $0x6c8] ss:$28 sps:$4 sm:$0xff]  }
 0x46b   : > { %4563 = vmatpush1.bf16.msra.mxu1 %v6338_v29  ;;  %4669 = vmatpush1.bf16.msra.mxu0 %v6341_v30  ;;  %v6407_v19 = vld [vmem:[%s8339_s9 + $0x698] ss:$28 sps:$4 sm:$0xff]   ;;  %v6412_v20 = vld [vmem:[%s8339_s9 + $0x6cc] ss:$28 sps:$4 sm:$0xff]  }
 0x46c   : > { %4564 = vmatprep.subr.bf16.mxu1 %v6346_v31  ;;  %4670 = vmatprep.subr.bf16.mxu0 %v6349_v32  ;;  %v6415_v25 = vld [vmem:[%s8339_s9 + $0x6d4] ss:$28 sps:$4 sm:$0xff]   ;;  %v6423_v32 = vld [vmem:[%s8339_s9 + $0x4c] ss:$28 sps:$4 sm:$0xff]  }
 0x46d   : > { %v6413_v27 = vld [vmem:[%s8339_s9 + $0x6d0] ss:$28 sps:$4 sm:$0xff]   ;;  %v6419_v29 = vld [vmem:[%s8339_s9 + $0x1d8] ss:$28 sps:$4 sm:$0xff]  }
 0x46e   : > { %v6418_v28 = vld [vmem:[%s8339_s9 + $0x14] ss:$28 sps:$4 sm:$0xff]  }
 0x46f   : > { %4565 = vmatpush1.bf16.msra.mxu1 %v6344_v33  ;;  %4671 = vmatpush1.bf16.msra.mxu0 %v6347_v34  ;;  %v6416_v30 = vld [vmem:[%s8339_s9 + $0x10] ss:$28 sps:$4 sm:$0xff]   ;;  %v6420_v31 = vld [vmem:[%s8339_s9 + $0x18] ss:$28 sps:$4 sm:$0xff]   ;;  %v6421_v34 = vld [vmem:[%s8339_s9 + $0x48] ss:$28 sps:$4 sm:$0xff]  }
 0x470   : > { %4566 = vmatprep.subr.bf16.mxu1 %v6352_v35  ;;  %4672 = vmatprep.subr.bf16.mxu0 %v6355_v36  ;;  %v6424_v33 = vld [vmem:[%s8339_s9 + $0x210] ss:$28 sps:$4 sm:$0xff]   ;;  %v6428_v36 = vld [vmem:[%s8339_s9 + $0x84] ss:$28 sps:$4 sm:$0xff]  }
 0x471   : > { %v6425_v35 = vld [vmem:[%s8339_s9 + $0x50] ss:$28 sps:$4 sm:$0xff]  }
 0x473   : > { %4567 = vmatpush1.bf16.msra.mxu1 %v6350_v37  ;;  %4673 = vmatpush1.bf16.msra.mxu0 %v6353_v38  ;;  %v6429_v37 = vld [vmem:[%s8339_s9 + $0x248] ss:$28 sps:$4 sm:$0xff]   ;;  %v6426_v38 = vld [vmem:[%s8339_s9 + $0x80] ss:$28 sps:$4 sm:$0xff]  }
 0x474   : > { %4568 = vmatprep.subr.bf16.mxu1 %v6358_v39  ;;  %4674 = vmatprep.subr.bf16.mxu0 %v6361_v40  ;;  %v6430_v39 = vld [vmem:[%s8339_s9 + $0x88] ss:$28 sps:$4 sm:$0xff]   ;;  %v6433_v40 = vld [vmem:[%s8339_s9 + $0xbc] ss:$28 sps:$4 sm:$0xff]  }
 0x477   : > { %4569 = vmatpush1.bf16.msra.mxu1 %v6356_v41  ;;  %4675 = vmatpush1.bf16.msra.mxu0 %v6359_v42  ;;  %v6434_v41 = vld [vmem:[%s8339_s9 + $0x280] ss:$28 sps:$4 sm:$0xff]   ;;  %v6431_v42 = vld [vmem:[%s8339_s9 + $0xb8] ss:$28 sps:$4 sm:$0xff]  }
 0x478   : > { %4570 = vmatprep.subr.bf16.mxu1 %v6364_v43  ;;  %4676 = vmatprep.subr.bf16.mxu0 %v6367_v48  ;;  %v6435_v43 = vld [vmem:[%s8339_s9 + $0xc0] ss:$28 sps:$4 sm:$0xff]   ;;  %v6438_v48 = vld [vmem:[%s8339_s9 + $0xf4] ss:$28 sps:$4 sm:$0xff]  }
 0x47b   : > { %4571 = vmatpush1.bf16.msra.mxu1 %v6362_v49  ;;  %4677 = vmatpush1.bf16.msra.mxu0 %v6365_v50  ;;  %v6436_v49 = vld [vmem:[%s8339_s9 + $0xf0] ss:$28 sps:$4 sm:$0xff]   ;;  %v6440_v50 = vld [vmem:[%s8339_s9 + $0xf8] ss:$28 sps:$4 sm:$0xff]  }
 0x47c   : > { %4572 = vmatprep.subr.bf16.mxu1 %v6370_v51  ;;  %4678 = vmatprep.subr.bf16.mxu0 %v6373_v52  ;;  %v6443_v51 = vld [vmem:[%s8339_s9 + $0x12c] ss:$28 sps:$4 sm:$0xff]  }
 0x47d   : > { %v6444_v52 = vld [vmem:[%s8339_s9 + $0x2f0] ss:$28 sps:$4 sm:$0xff]  }
 0x47f   : > { %4573 = vmatpush1.bf16.msra.mxu1 %v6368_v53  ;;  %4679 = vmatpush1.bf16.msra.mxu0 %v6371_v55  ;;  %v6441_v53 = vld [vmem:[%s8339_s9 + $0x128] ss:$28 sps:$4 sm:$0xff]   ;;  %v6445_v55 = vld [vmem:[%s8339_s9 + $0x130] ss:$28 sps:$4 sm:$0xff]  }
 0x480   : > { %4574 = vmatprep.subr.bf16.mxu1 %v6376_v54  ;;  %4680 = vmatprep.subr.bf16.mxu0 %v6379_v0  ;;  %v6448_v54 = vld [vmem:[%s8339_s9 + $0x164] ss:$28 sps:$4 sm:$0xff]  }
 0x481   : > { %v6449_v0 = vld [vmem:[%s8339_s9 + $0x328] ss:$28 sps:$4 sm:$0xff]  }
 0x483   : > { %4575 = vmatpush1.bf16.msra.mxu1 %v6374_v56  ;;  %4681 = vmatpush1.bf16.msra.mxu0 %v6377_v1  ;;  %v6446_v56 = vld [vmem:[%s8339_s9 + $0x160] ss:$28 sps:$4 sm:$0xff]   ;;  %v6450_v1 = vld [vmem:[%s8339_s9 + $0x168] ss:$28 sps:$4 sm:$0xff]  }
 0x484   : > { %4576 = vmatprep.subr.bf16.mxu1 %v6382_v2  ;;  %4682 = vmatprep.subr.bf16.mxu0 %v6385_v3  ;;  %v6453_v2 = vld [vmem:[%s8339_s9 + $0x19c] ss:$28 sps:$4 sm:$0xff]  }
 0x485   : > { %v6454_v3 = vld [vmem:[%s8339_s9 + $0x360] ss:$28 sps:$4 sm:$0xff]  }
 0x487   : > { %4577 = vmatpush1.bf16.msra.mxu1 %v6380_v4  ;;  %4683 = vmatpush1.bf16.msra.mxu0 %v6383_v5  ;;  %v6451_v4 = vld [vmem:[%s8339_s9 + $0x198] ss:$28 sps:$4 sm:$0xff]   ;;  %v6455_v5 = vld [vmem:[%s8339_s9 + $0x1a0] ss:$28 sps:$4 sm:$0xff]  }
 0x488   : > { %4578 = vmatprep.subr.bf16.mxu1 %v6388_v6  ;;  %4684 = vmatprep.subr.bf16.mxu0 %v6391_v7  ;;  %v6458_v6 = vld [vmem:[%s8339_s9 + $0x1d4] ss:$28 sps:$4 sm:$0xff]  }
 0x489   : > { %v6459_v7 = vld [vmem:[%s8339_s9 + $0x558] ss:$28 sps:$4 sm:$0xff]  }
 0x48b   : > { %4579 = vmatpush1.bf16.msra.mxu1 %v6386_v8  ;;  %4685 = vmatpush1.bf16.msra.mxu0 %v6389_v9  ;;  %v6456_v8 = vld [vmem:[%s8339_s9 + $0x1d0] ss:$28 sps:$4 sm:$0xff]   ;;  %v6460_v9 = vld [vmem:[%s8339_s9 + $0x398] ss:$28 sps:$4 sm:$0xff]  }
 0x48c   : > { %4580 = vmatprep.subr.bf16.mxu1 %v6394_v10  ;;  %4686 = vmatprep.subr.bf16.mxu0 %v6397_v58  ;;  %v6463_v10 = vld [vmem:[%s8339_s9 + $0x20c] ss:$28 sps:$4 sm:$0xff]  }
 0x48d   : > { %v6464_v58 = vld [vmem:[%s8339_s9 + $0x590] ss:$28 sps:$4 sm:$0xff]  }
 0x48f   : > { %4581 = vmatpush1.bf16.msra.mxu1 %v6392_v11  ;;  %4687 = vmatpush1.bf16.msra.mxu0 %v6395_v12  ;;  %v6461_v11 = vld [vmem:[%s8339_s9 + $0x208] ss:$28 sps:$4 sm:$0xff]   ;;  %v6465_v12 = vld [vmem:[%s8339_s9 + $0x3d0] ss:$28 sps:$4 sm:$0xff]  }
 0x490   : > { %4582 = vmatprep.subr.bf16.mxu1 %v6400_v59  ;;  %4688 = vmatprep.subr.bf16.mxu0 %v6403_v13  ;;  %v6468_v59 = vld [vmem:[%s8339_s9 + $0x244] ss:$28 sps:$4 sm:$0xff]  }
 0x491   : > { %v6469_v13 = vld [vmem:[%s8339_s9 + $0x5c8] ss:$28 sps:$4 sm:$0xff]  }
 0x493   : > { %4583 = vmatpush1.bf16.msra.mxu1 %v6398_v15  ;;  %4689 = vmatpush1.bf16.msra.mxu0 %v6401_v61  ;;  %v6466_v15 = vld [vmem:[%s8339_s9 + $0x240] ss:$28 sps:$4 sm:$0xff]   ;;  %v6470_v61 = vld [vmem:[%s8339_s9 + $0x408] ss:$28 sps:$4 sm:$0xff]  }
 0x494   : > { %4584 = vmatprep.subr.bf16.mxu1 %v6406_v63  ;;  %4690 = vmatprep.subr.bf16.mxu0 %v6409_v14  ;;  %v6473_v63 = vld [vmem:[%s8339_s9 + $0x27c] ss:$28 sps:$4 sm:$0xff]  }
 0x495   : > { %v6474_v14 = vld [vmem:[%s8339_s9 + $0x600] ss:$28 sps:$4 sm:$0xff]  }
 0x497   : > { %4585 = vmatpush1.bf16.msra.mxu1 %v6404_v17  ;;  %4691 = vmatpush1.bf16.msra.mxu0 %v6407_v19  ;;  %v6471_v17 = vld [vmem:[%s8339_s9 + $0x278] ss:$28 sps:$4 sm:$0xff]   ;;  %v6475_v19 = vld [vmem:[%s8339_s9 + $0x440] ss:$28 sps:$4 sm:$0xff]  }
 0x498   : > { %4586 = vmatprep.subr.bf16.mxu1 %v6412_v20  ;;  %4692 = vmatprep.subr.bf16.mxu0 %v6415_v25  ;;  %v6478_v20 = vld [vmem:[%s8339_s9 + $0x2b4] ss:$28 sps:$4 sm:$0xff]  }
 0x499   : > { %v6479_v25 = vld [vmem:[%s8339_s9 + $0x638] ss:$28 sps:$4 sm:$0xff]  }
 0x49b   : > { %4587 = vmatpush1.bf16.msra.mxu1 %v6410_v26  ;;  %4693 = vmatpush1.bf16.msra.mxu0 %v6413_v27  ;;  %v6476_v26 = vld [vmem:[%s8339_s9 + $0x2b0] ss:$28 sps:$4 sm:$0xff]   ;;  %v6480_v27 = vld [vmem:[%s8339_s9 + $0x478] ss:$28 sps:$4 sm:$0xff]  }
 0x49c   : > { %4715 = vmatprep.subr.bf16.mxu1 %v6418_v28  ;;  %5627 = vmatprep.subr.bf16.mxu0 %v6419_v29  ;;  %v6483_v28 = vld [vmem:[%s8339_s9 + $0x2ec] ss:$28 sps:$4 sm:$0xff]  }
 0x49d   : > { %v6484_v29 = vld [vmem:[%s8339_s9 + $0x670] ss:$28 sps:$4 sm:$0xff]  }
 0x49e   : > { %4589 = vmatmul.mubr.bf16.vlgmr.msra.gmra.mrb[24].mxu1 %v7750_v45  ;;  %4695 = vmatmul.mubr.bf16.vlgmr.msra.gmra.mrb[40].mxu0 %v7750_v45 }
 0x49f   : > { %4598 = vmatprep.mubr.bf16.mxu1 %v7790_v24  ;;  %4704 = vmatprep.mubr.bf16.mxu0 %v7790_v24 }
 0x4a0   : > { %4716 = vmatpush1.bf16.msra.mxu1 %v6416_v30  ;;  %5628 = vmatpush3.bf16.msra.mxu0 %v6420_v31  ;;  %v6481_v30 = vld [vmem:[%s8339_s9 + $0x2e8] ss:$28 sps:$4 sm:$0xff]   ;;  %v6485_v31 = vld [vmem:[%s8339_s9 + $0x4b0] ss:$28 sps:$4 sm:$0xff]  }
 0x4a1   : > { %4717 = vmatprep.subr.bf16.mxu1 %v6423_v32  ;;  %5629 = vmatprep.subr.bf16.mxu0 %v6424_v33  ;;  %v6488_v32 = vld [vmem:[%s8339_s9 + $0x324] ss:$28 sps:$4 sm:$0xff]  }
 0x4a2   : > { %v6489_v33 = vld [vmem:[%s8339_s9 + $0x6a8] ss:$28 sps:$4 sm:$0xff]  }
 0x4a4   : > { %4718 = vmatpush1.bf16.msra.mxu1 %v6421_v34  ;;  %5630 = vmatpush3.bf16.msra.mxu0 %v6425_v35  ;;  %v6486_v34 = vld [vmem:[%s8339_s9 + $0x320] ss:$28 sps:$4 sm:$0xff]   ;;  %v6490_v35 = vld [vmem:[%s8339_s9 + $0x4e8] ss:$28 sps:$4 sm:$0xff]  }
 0x4a5   : > { %4719 = vmatprep.subr.bf16.mxu1 %v6428_v36  ;;  %5631 = vmatprep.subr.bf16.mxu0 %v6429_v37  ;;  %v6493_v36 = vld [vmem:[%s8339_s9 + $0x35c] ss:$28 sps:$4 sm:$0xff]  }
 0x4a6   : > { %4599 = vmatmul.mubr.bf16.gmra.mrb[28].mxu1 %v7786_v22  ;;  %4705 = vmatmul.mubr.bf16.gmra.mrb[44].mxu0 %v7786_v22  ;;  %v6494_v37 = vld [vmem:[%s8339_s9 + $0x6e0] ss:$28 sps:$4 sm:$0xff]  }
 0x4a7   : > { %4747 = vmatprep.mubr.bf16.mxu1 %v7752_v46  ;;  %4853 = vmatprep.mubr.bf16.mxu0 %v7752_v46  ;;  %v6439_v46 = vld [vmem:[%s8339_s9 + $0x2b8] ss:$28 sps:$4 sm:$0xff]  }
 0x4a8   : > { %4720 = vmatpush1.bf16.msra.mxu1 %v6426_v38  ;;  %5632 = vmatpush3.bf16.msra.mxu0 %v6430_v39  ;;  %v6491_v38 = vld [vmem:[%s8339_s9 + $0x358] ss:$28 sps:$4 sm:$0xff]   ;;  %v6495_v39 = vld [vmem:[%s8339_s9 + $0x520] ss:$28 sps:$4 sm:$0xff]  }
 0x4a9   : > { %4721 = vmatprep.subr.bf16.mxu1 %v6433_v40  ;;  %5633 = vmatprep.subr.bf16.mxu0 %v6434_v41  ;;  %v6498_v40 = vld [vmem:[%s8339_s9 + $0x394] ss:$28 sps:$4 sm:$0xff]  }
 0x4aa   : > { %v6496_v41 = vld [vmem:[%s8339_s9 + $0x390] ss:$28 sps:$4 sm:$0xff]  }
 0x4ac   : > { %4722 = vmatpush1.bf16.msra.mxu1 %v6431_v42  ;;  %5634 = vmatpush3.bf16.msra.mxu0 %v6435_v43  ;;  %v6501_v42 = vld [vmem:[%s8339_s9 + $0x3cc] ss:$28 sps:$4 sm:$0xff]  }
 0x4ad   : > { %4723 = vmatprep.subr.bf16.mxu1 %v6438_v48  ;;  %5635 = vmatprep.subr.bf16.mxu0 %v6439_v46  ;;  %v6499_v43 = vld [vmem:[%s8339_s9 + $0x3c8] ss:$28 sps:$4 sm:$0xff]   ;;  %v6505_v46 = vld [vmem:[%s8339_s9 + $0x438] ss:$28 sps:$4 sm:$0xff]  }
 0x4ae   : > { %v6504_v48 = vld [vmem:[%s8339_s9 + $0x404] ss:$28 sps:$4 sm:$0xff]  }
 0x4b0   : > { %4724 = vmatpush1.bf16.msra.mxu1 %v6436_v49  ;;  %5636 = vmatpush3.bf16.msra.mxu0 %v6440_v50  ;;  %v6510_v49 = vld [vmem:[%s8339_s9 + $0x474] ss:$28 sps:$4 sm:$0xff]  }
 0x4b1   : > { %4725 = vmatprep.subr.bf16.mxu1 %v6443_v51  ;;  %5637 = vmatprep.subr.bf16.mxu0 %v6444_v52  ;;  %v6508_v50 = vld [vmem:[%s8339_s9 + $0x470] ss:$28 sps:$4 sm:$0xff]   ;;  %v6516_v51 = vld [vmem:[%s8339_s9 + $0x4e4] ss:$28 sps:$4 sm:$0xff]  }
 0x4b2   : > { %v6514_v52 = vld [vmem:[%s8339_s9 + $0x4e0] ss:$28 sps:$4 sm:$0xff]  }
 0x4b4   : > { %4726 = vmatpush1.bf16.msra.mxu1 %v6441_v53  ;;  %5638 = vmatpush3.bf16.msra.mxu0 %v6445_v55  ;;  %v6519_v53 = vld [vmem:[%s8339_s9 + $0x51c] ss:$28 sps:$4 sm:$0xff]  }
 0x4b5   : > { %4727 = vmatprep.subr.bf16.mxu1 %v6448_v54  ;;  %5639 = vmatprep.subr.bf16.mxu0 %v6449_v0  ;;  %v6517_v55 = vld [vmem:[%s8339_s9 + $0x518] ss:$28 sps:$4 sm:$0xff]   ;;  %v6520_v0 = vld [vmem:[%s8339_s9 + $0x550] ss:$28 sps:$4 sm:$0xff]  }
 0x4b6   : > { %v6522_v54 = vld [vmem:[%s8339_s9 + $0x554] ss:$28 sps:$4 sm:$0xff]  }
 0x4b8   : > { %4728 = vmatpush1.bf16.msra.mxu1 %v6446_v56  ;;  %5640 = vmatpush3.bf16.msra.mxu0 %v6450_v1  ;;  %v6525_v56 = vld [vmem:[%s8339_s9 + $0x58c] ss:$28 sps:$4 sm:$0xff]  }
 0x4b9   : > { %4729 = vmatprep.subr.bf16.mxu1 %v6453_v2  ;;  %5641 = vmatprep.subr.bf16.mxu0 %v6454_v3  ;;  %v6523_v1 = vld [vmem:[%s8339_s9 + $0x588] ss:$28 sps:$4 sm:$0xff]   ;;  %v6526_v3 = vld [vmem:[%s8339_s9 + $0x5c0] ss:$28 sps:$4 sm:$0xff]  }
 0x4ba   : > { %v6528_v2 = vld [vmem:[%s8339_s9 + $0x5c4] ss:$28 sps:$4 sm:$0xff]  }
 0x4bc   : > { %4730 = vmatpush1.bf16.msra.mxu1 %v6451_v4  ;;  %5642 = vmatpush3.bf16.msra.mxu0 %v6455_v5  ;;  %v6531_v4 = vld [vmem:[%s8339_s9 + $0x5fc] ss:$28 sps:$4 sm:$0xff]  }
 0x4bd   : > { %4731 = vmatprep.subr.bf16.mxu1 %v6458_v6  ;;  %5655 = vmatprep.subr.bf16.mxu0 %v6459_v7  ;;  %v6529_v5 = vld [vmem:[%s8339_s9 + $0x5f8] ss:$28 sps:$4 sm:$0xff]   ;;  %v6532_v7 = vld [vmem:[%s8339_s9 + $0x630] ss:$28 sps:$4 sm:$0xff]  }
 0x4be   : > { %v6534_v6 = vld [vmem:[%s8339_s9 + $0x634] ss:$28 sps:$4 sm:$0xff]  }
 0x4bf   : > { %4854 = vmatmul.mubr.bf16.vlgmr.msra.gmra.mrb[48].mxu0 %v7748_v44 }
 0x4c0   : > { %4732 = vmatpush1.bf16.msra.mxu1 %v6456_v8  ;;  %4861 = vmatprep.mubr.bf16.mxu0 %v7788_v23  ;;  %v6537_v8 = vld [vmem:[%s8339_s9 + $0x66c] ss:$28 sps:$4 sm:$0xff]  }
 0x4c1   : > { %5656 = vmatpush3.bf16.msra.mxu0 %v6460_v9  ;;  %4733 = vmatprep.subr.bf16.mxu1 %v6463_v10  ;;  %v6535_v9 = vld [vmem:[%s8339_s9 + $0x668] ss:$28 sps:$4 sm:$0xff]  }
 0x4c2   : > { %5657 = vmatprep.subr.bf16.mxu0 %v6464_v58  ;;  %v6540_v10 = vld [vmem:[%s8339_s9 + $0x6a4] ss:$28 sps:$4 sm:$0xff]  }
 0x4c3   : > { %v6538_v58 = vld [vmem:[%s8339_s9 + $0x6a0] ss:$28 sps:$4 sm:$0xff]  }
 0x4c4   : > { %4734 = vmatpush1.bf16.msra.mxu1 %v6461_v11  ;;  %v6543_v11 = vld [vmem:[%s8339_s9 + $0x6dc] ss:$28 sps:$4 sm:$0xff]  }
 0x4c5   : > { %5658 = vmatpush3.bf16.msra.mxu0 %v6465_v12  ;;  %4735 = vmatprep.subr.bf16.mxu1 %v6468_v59  ;;  %v6541_v12 = vld [vmem:[%s8339_s9 + $0x6d8] ss:$28 sps:$4 sm:$0xff]   ;;  %v8273_v59 = vld [vmem:[%s8340_s10] sm:$0x7f] }
 0x4c6   : > { %5659 = vmatprep.subr.bf16.mxu0 %v6469_v13  ;;  %v3319_v13 = vrot.slane %v8273_v59, %v7352_v60 }
 0x4c7   : > { %4862 = vmatmul.mubr.bf16.gmra.mrb[52].mxu0 %v7784_v21 }
 0x4c8   : > { %4736 = vmatpush1.bf16.msra.mxu1 %v6466_v15  ;;  %4902 = vmatprep.mubr.bf16.mxu0 %v7754_v47  ;;  %v3327_v15 = vrot.slane %v8273_v59, %v7367_v16 }
 0x4c9   : > { %5660 = vmatpush3.bf16.msra.mxu0 %v6470_v61  ;;  %4737 = vmatprep.subr.bf16.mxu1 %v6473_v63  ;;  %v3323_v61 = vrot.slane %v8273_v59, %v7357_v62 }
 0x4ca   : > { %5661 = vmatprep.subr.bf16.mxu0 %v6474_v14 }
 0x4cc   : > { %4738 = vmatpush1.bf16.msra.mxu1 %v6471_v17 }
 0x4cd   : > { %5662 = vmatpush3.bf16.msra.mxu0 %v6475_v19  ;;  %4739 = vmatprep.subr.bf16.mxu1 %v6478_v20 }
 0x4ce   : > { %5663 = vmatprep.subr.bf16.mxu0 %v6479_v25 }
 0x4d0   : > { %4740 = vmatpush1.bf16.msra.mxu1 %v6476_v26 }
 0x4d1   : > { %5664 = vmatpush3.bf16.msra.mxu0 %v6480_v27  ;;  %4741 = vmatprep.subr.bf16.mxu1 %v6483_v28 }
 0x4d2   : > { %5665 = vmatprep.subr.bf16.mxu0 %v6484_v29 }
 0x4d4   : > { %4742 = vmatpush1.bf16.msra.mxu1 %v6481_v30 }
 0x4d5   : > { %5666 = vmatpush3.bf16.msra.mxu0 %v6485_v31  ;;  %4743 = vmatprep.subr.bf16.mxu1 %v6488_v32 }
 0x4d6   : > { %5667 = vmatprep.subr.bf16.mxu0 %v6489_v33 }
 0x4d8   : > { %4744 = vmatpush1.bf16.msra.mxu1 %v6486_v34 }
 0x4d9   : > { %5668 = vmatpush3.bf16.msra.mxu0 %v6490_v35  ;;  %4745 = vmatprep.subr.bf16.mxu1 %v6493_v36 }
 0x4da   : > { %5669 = vmatprep.subr.bf16.mxu0 %v6494_v37 }
 0x4dc   : > { %4746 = vmatpush1.bf16.msra.mxu1 %v6491_v38 }
 0x4dd   : > { %5670 = vmatpush3.bf16.msra.mxu0 %v6495_v39  ;;  %4768 = vmatprep.subr.bf16.mxu1 %v6498_v40 }
 0x4df   : > { %4748 = vmatmul.mubr.bf16.vlgmr.msra.gmra.mrb[32].mxu1 %v7748_v44  ;;  %v6502_v44 = vld [vmem:[%s8339_s9 + $0x400] ss:$28 sps:$4 sm:$0xff]  }
 0x4e0   : > { %4903 = vmatmul.mubr.bf16.vlgmr.msra.gmra.mrb[56].mxu0 %v7750_v45  ;;  %4757 = vmatprep.mubr.bf16.mxu1 %v7788_v23  ;;  %v6507_v23 = vld [vmem:[%s8339_s9 + $0x43c] ss:$28 sps:$4 sm:$0xff]  }
 0x4e1   : > { %4769 = vmatpush1.bf16.msra.mxu1 %v6496_v41  ;;  %4910 = vmatprep.mubr.bf16.mxu0 %v7790_v24 }
 0x4e2   : > { %4770 = vmatprep.subr.bf16.mxu1 %v6501_v42 }
 0x4e5   : > { %4771 = vmatpush1.bf16.msra.mxu1 %v6499_v43 }
 0x4e6   : > { %4772 = vmatprep.subr.bf16.mxu1 %v6504_v48 }
 0x4e7   : > { %4758 = vmatmul.mubr.bf16.gmra.mrb[36].mxu1 %v7784_v21  ;;  %v6511_v21 = vld [vmem:[%s8339_s9 + $0x4a8] ss:$28 sps:$4 sm:$0xff]  }
 0x4e8   : > { %4911 = vmatmul.mubr.bf16.gmra.mrb[60].mxu0 %v7786_v22  ;;  %4800 = vmatprep.mubr.bf16.mxu1 %v7754_v47  ;;  %v6513_v47 = vld [vmem:[%s8339_s9 + $0x4ac] ss:$28 sps:$4 sm:$0xff]  }
 0x4e9   : > { %4773 = vmatpush1.bf16.msra.mxu1 %v6502_v44 }
 0x4ea   : > { %4774 = vmatprep.subr.bf16.mxu1 %v6507_v23 }
 0x4ed   : > { %4775 = vmatpush1.bf16.msra.mxu1 %v6505_v46 }
 0x4ee   : > { %4776 = vmatprep.subr.bf16.mxu1 %v6510_v49 }
 0x4f1   : > { %4777 = vmatpush1.bf16.msra.mxu1 %v6508_v50 }
 0x4f2   : > { %4778 = vmatprep.subr.bf16.mxu1 %v6513_v47 }
 0x4f5   : > { %4779 = vmatpush1.bf16.msra.mxu1 %v6511_v21 }
 0x4f6   : > { %4780 = vmatprep.subr.bf16.mxu1 %v6516_v51 }
 0x4f9   : > { %4781 = vmatpush1.bf16.msra.mxu1 %v6514_v52 }
 0x4fa   : > { %4782 = vmatprep.subr.bf16.mxu1 %v6519_v53 }
 0x4fd   : > { %4783 = vmatpush1.bf16.msra.mxu1 %v6517_v55 }
 0x4fe   : > { %4784 = vmatprep.subr.bf16.mxu1 %v6522_v54 }
 0x501   : > { %4785 = vmatpush1.bf16.msra.mxu1 %v6520_v0 }
 0x502   : > { %4786 = vmatprep.subr.bf16.mxu1 %v6525_v56  ;;  %v3342_v56 = vsub.s32 6, %v7345_v57 }
 0x505   : > { %4787 = vmatpush1.bf16.msra.mxu1 %v6523_v1  ;;  %v3343_v1 = vrot.slane %v8273_v59, %v3342_v56 }
 0x506   : > { %4788 = vmatprep.subr.bf16.mxu1 %v6528_v2 }
 0x509   : > { %4789 = vmatpush1.bf16.msra.mxu1 %v6526_v3 }
 0x50a   : > { %4790 = vmatprep.subr.bf16.mxu1 %v6531_v4 }
 0x50d   : > { %4791 = vmatpush1.bf16.msra.mxu1 %v6529_v5 }
 0x50e   : > { %4792 = vmatprep.subr.bf16.mxu1 %v6534_v6 }
 0x511   : > { %4793 = vmatpush1.bf16.msra.mxu1 %v6532_v7 }
 0x512   : > { %4794 = vmatprep.subr.bf16.mxu1 %v6537_v8 }
 0x515   : > { %4795 = vmatpush1.bf16.msra.mxu1 %v6535_v9 }
 0x516   : > { %4796 = vmatprep.subr.bf16.mxu1 %v6540_v10 }
 0x519   : > { %4797 = vmatpush1.bf16.msra.mxu1 %v6538_v58 }
 0x51a   : > { %4798 = vmatprep.subr.bf16.mxu1 %v6543_v11 }
 0x51d   : > { %4799 = vmatpush1.bf16.msra.mxu1 %v6541_v12 }
 0x520   : > { %4801 = vmatmul.mubr.bf16.vlgmr.msra.gmra.mrb[32].mxu1 %v7750_v45  ;;  %v3331_v45 = vrot.slane %v8273_v59, %v7370_v18 }
 0x521   : > { %4810 = vmatprep.mubr.bf16.mxu1 %v7790_v24 }
 0x528   : > { %4811 = vmatmul.mubr.bf16.gmra.mrb[36].mxu1 %v7786_v22 }
 0x571   : > { %v4590_v22 = vpop.f32.mrb[24].mxu1  ;;  %v4696_v24 = vpop.f32.mrb[40].mxu0 }
 0x572   : > { %v5707_v60 = vadd.f32 %v4590_v22, %v3319_v13  ;;  %v5715_v63 = vadd.f32 %v4696_v24, %v3327_v15  ;;  %v4592_v16 = vpop.f32.mrb[25].mxu1  ;;  %v4698_v14 = vpop.f32.mrb[41].mxu0 }
 0x573   : > { %v5708_v62 = vadd.f32 %v4592_v16, %v3323_v61  ;;  %v5716_v18 = vadd.f32 %v4698_v14, %v3331_v45  ;;  %v4594_v17 = vpop.f32.mrb[26].mxu1  ;;  %v4700_v19 = vpop.f32.mrb[42].mxu0  ;;  %v3334_v16 = vsub.s32 4, %v7345_v57  ;;  %v3338_v14 = vsub.s32 5, %v7345_v57 }
 0x574   : > { %4919 = vst [vmem:[%s8287_s25] sm:$0xff] %v5707_v60  ;;  %4921 = vst [vmem:[%s8287_s25 + $0x10] sm:$0xff] %v5715_v63  ;;  %v5709_v20 = vadd.f32 %v4594_v17, %v3319_v13  ;;  %v5717_v25 = vadd.f32 %v4700_v19, %v3327_v15  ;;  %v4596_v26 = vpop.f32.mrb[27].mxu1  ;;  %v4702_v27 = vpop.f32.mrb[43].mxu0 }
 0x575   : > { %4920 = vst [vmem:[%s8287_s25 + $0x8] sm:$0xff] %v5708_v62  ;;  %4922 = vst [vmem:[%s8287_s25 + $0x18] sm:$0xff] %v5716_v18  ;;  %v5710_v28 = vadd.f32 %v4596_v26, %v3323_v61  ;;  %v5718_v29 = vadd.f32 %v4702_v27, %v3331_v45  ;;  %v3335_v62 = vrot.slane %v8273_v59, %v3334_v16 }
 0x576   : > { %4926 = vst [vmem:[%s8287_s25 + $0x38] sm:$0xff] %v5709_v20  ;;  %4928 = vst [vmem:[%s8287_s25 + $0x48] sm:$0xff] %v5717_v25  ;;  %v3339_v18 = vrot.slane %v8273_v59, %v3338_v14 }
 0x577   : > { %4927 = vst [vmem:[%s8287_s25 + $0x40] sm:$0xff] %v5710_v28  ;;  %4929 = vst [vmem:[%s8287_s25 + $0x50] sm:$0xff] %v5718_v29 }
 0x579   : > { %v4600_v30 = vpop.f32.mrb[28].mxu1  ;;  %v4706_v31 = vpop.f32.mrb[44].mxu0 }
 0x57a   : > { %v5711_v32 = vadd.f32 %v4600_v30, %v3319_v13  ;;  %v5719_v33 = vadd.f32 %v4706_v31, %v3327_v15  ;;  %v4602_v34 = vpop.f32.mrb[29].mxu1  ;;  %v4708_v35 = vpop.f32.mrb[45].mxu0 }
 0x57b   : > { %v5712_v36 = vadd.f32 %v4602_v34, %v3323_v61  ;;  %v5720_v37 = vadd.f32 %v4708_v35, %v3331_v45  ;;  %v4604_v38 = vpop.f32.mrb[30].mxu1  ;;  %v4710_v39 = vpop.f32.mrb[46].mxu0 }
 0x57c   : > { %4933 = vst [vmem:[%s8287_s25 + $0x70] sm:$0xff] %v5711_v32  ;;  %4935 = vst [vmem:[%s8287_s25 + $0x80] sm:$0xff] %v5719_v33  ;;  %v5713_v40 = vadd.f32 %v4604_v38, %v3319_v13  ;;  %v5721_v41 = vadd.f32 %v4710_v39, %v3327_v15  ;;  %v4606_v42 = vpop.f32.mrb[31].mxu1  ;;  %v4712_v43 = vpop.f32.mrb[47].mxu0 }
 0x57d   : > { %4934 = vst [vmem:[%s8287_s25 + $0x78] sm:$0xff] %v5712_v36  ;;  %4936 = vst [vmem:[%s8287_s25 + $0x88] sm:$0xff] %v5720_v37  ;;  %v5714_v48 = vadd.f32 %v4606_v42, %v3323_v61  ;;  %v5722_v44 = vadd.f32 %v4712_v43, %v3331_v45 }
 0x57e   : > { %4940 = vst [vmem:[%s8287_s25 + $0xa8] sm:$0xff] %v5713_v40  ;;  %4942 = vst [vmem:[%s8287_s25 + $0xb8] sm:$0xff] %v5721_v41 }
 0x57f   : > { %4941 = vst [vmem:[%s8287_s25 + $0xb0] sm:$0xff] %v5714_v48  ;;  %4943 = vst [vmem:[%s8287_s25 + $0xc0] sm:$0xff] %v5722_v44 }
 0x592   : > { %v5643_v23 = vpop.f32.mrb[48].mxu0 }
 0x593   : > { %v5644_v46 = vpop.f32.mrb[49].mxu0 }
 0x594   : > { %v5645_v49 = vadd.f32 %v5644_v46, %v5643_v23  ;;  %v5646_v50 = vpop.f32.mrb[50].mxu0 }
 0x595   : > { %v5647_v47 = vpop.f32.mrb[51].mxu0 }
 0x596   : > { %v5648_v21 = vadd.f32 %v5647_v47, %v5646_v50  ;;  %v4856_v4 = vadd.f32 %v5645_v49, %v3343_v1 }
 0x598   : > { %v4859_v8 = vadd.f32 %v5648_v21, %v3343_v1 }
 0x59a   : > { %v5649_v51 = vpop.f32.mrb[52].mxu0 }
 0x59b   : > { %v5650_v52 = vpop.f32.mrb[53].mxu0 }
 0x59c   : > { %v5651_v53 = vadd.f32 %v5650_v52, %v5649_v51  ;;  %v5652_v55 = vpop.f32.mrb[54].mxu0 }
 0x59d   : > { %v5653_v54 = vpop.f32.mrb[55].mxu0 }
 0x59e   : > { %v5654_v0 = vadd.f32 %v5653_v54, %v5652_v55  ;;  %v4864_v13 = vadd.f32 %v5651_v53, %v3343_v1 }
 0x5a0   : > { %v4867_v22 = vadd.f32 %v5654_v0, %v3343_v1 }
 0x5b3   : > { %v5671_v2 = vpop.f32.mrb[56].mxu0 }
 0x5b4   : > { %v5672_v3 = vpop.f32.mrb[57].mxu0 }
 0x5b5   : > { %v5673_v5 = vadd.f32 %v5672_v3, %v5671_v2  ;;  %v5674_v6 = vpop.f32.mrb[58].mxu0 }
 0x5b6   : > { %v5675_v7 = vpop.f32.mrb[59].mxu0 }
 0x5b7   : > { %v4905_v9 = vadd.f32 %v5673_v5, %v4856_v4  ;;  %v5676_v10 = vadd.f32 %v5675_v7, %v5674_v6 }
 0x5b9   : > { %4925 = vst.msk [vmem:[%s8287_s25 + $0x30] sm:$0xff] %vm1721_vm0, %v4905_v9  ;;  %v4908_v58 = vadd.f32 %v5676_v10, %v4859_v8 }
 0x5bb   : > { %4932 = vst.msk [vmem:[%s8287_s25 + $0x68] sm:$0xff] %vm1721_vm0, %v4908_v58  ;;  %v5677_v11 = vpop.f32.mrb[60].mxu0 }
 0x5bc   : > { %v5678_v12 = vpop.f32.mrb[61].mxu0 }
 0x5bd   : > { %v5679_v15 = vadd.f32 %v5678_v12, %v5677_v11  ;;  %v5680_v61 = vpop.f32.mrb[62].mxu0 }
 0x5be   : > { %v5681_v45 = vpop.f32.mrb[63].mxu0 }
 0x5bf   : > { %v4913_v24 = vadd.f32 %v5679_v15, %v4864_v13  ;;  %v5682_v60 = vadd.f32 %v5681_v45, %v5680_v61 }
 0x5c1   : > { %4939 = vst.msk [vmem:[%s8287_s25 + $0xa0] sm:$0xff] %vm1721_vm0, %v4913_v24  ;;  %v4916_v63 = vadd.f32 %v5682_v60, %v4867_v22 }
 0x5c3   : > { %4946 = vst.msk [vmem:[%s8287_s25 + $0xd8] sm:$0xff] %vm1721_vm0, %v4916_v63 }
 0x5f3   : > { %v4802_v17 = vpop.f32.mrb[32].mxu1 }
 0x5f4   : > { %v5723_v19 = vadd.f32 %v4802_v17, %v3335_v62  ;;  %v4804_v20 = vpop.f32.mrb[33].mxu1 }
 0x5f5   : > { %v5724_v25 = vadd.f32 %v4804_v20, %v3339_v18  ;;  %v4806_v26 = vpop.f32.mrb[34].mxu1 }
 0x5f6   : > { %4923 = vst [vmem:[%s8287_s25 + $0x20] sm:$0xff] %v5723_v19  ;;  %v5725_v27 = vadd.f32 %v4806_v26, %v3335_v62  ;;  %v4808_v28 = vpop.f32.mrb[35].mxu1 }
 0x5f7   : > { %4924 = vst [vmem:[%s8287_s25 + $0x28] sm:$0xff] %v5724_v25  ;;  %v5726_v29 = vadd.f32 %v4808_v28, %v3339_v18 }
 0x5f8   : > { %4930 = vst [vmem:[%s8287_s25 + $0x58] sm:$0xff] %v5725_v27 }
 0x5f9   : > { %4931 = vst [vmem:[%s8287_s25 + $0x60] sm:$0xff] %v5726_v29 }
 0x5fb   : > { %v4812_v57 = vpop.f32.mrb[36].mxu1 }
 0x5fc   : > { %v5727_v30 = vadd.f32 %v4812_v57, %v3335_v62  ;;  %v4814_v31 = vpop.f32.mrb[37].mxu1 }
 0x5fd   : > { %v5728_v59 = vadd.f32 %v4814_v31, %v3339_v18  ;;  %v4816_v32 = vpop.f32.mrb[38].mxu1 }
 0x5fe   : > { %4937 = vst [vmem:[%s8287_s25 + $0x90] sm:$0xff] %v5727_v30  ;;  %v5729_v33 = vadd.f32 %v4816_v32, %v3335_v62  ;;  %v4818_v34 = vpop.f32.mrb[39].mxu1 }
 0x5ff   : > { %4938 = vst [vmem:[%s8287_s25 + $0x98] sm:$0xff] %v5728_v59  ;;  %v5730_v35 = vadd.f32 %v4818_v34, %v3339_v18 }
 0x600   : > { %4944 = vst [vmem:[%s8287_s25 + $0xc8] sm:$0xff] %v5729_v33 }
 0x601   : > { %4945 = vst [vmem:[%s8287_s25 + $0xd0] sm:$0xff] %v5730_v35 }
 0x602 PF: > { %s23_s21 = sadd.s32 1, %s6550_s21  }
 0x603   : > { %p20_p4 = scmp.ge.s32.totalorder %s23_s21, 4  }
 0x605   :  { %22 = sbr.rel (!%p20_p4) target bundleno = 1 (0x1), region = 106 }

</bundles_post_ra>
